<compile_context>
chip_gen: v6e
topology: v6e:2x2x1
jax: 0.10.0
libtpu: 0.0.40
codegen_flags: <defaults>
</compile_context>

<pallas_src>
import jax
import jax.numpy as jnp
from jax.experimental import pallas as pl
from jax.experimental.pallas import tpu as pltpu

_HIDDEN = 2048
_TH = 256                      # hidden-dim tile for the streaming path
_MIB = 1024 * 1024
_TM_CANDIDATES = (1024, 512, 256, 128, 64, 32, 16, 8)


def _round_up(x, m):
    return ((x + m - 1) // m) * m


def _vmem_budget_bytes():
    """Physical VMEM minus headroom for compiler scratch / semaphores."""
    try:
        phys = pltpu.get_tpu_info().vmem_capacity_bytes
    except Exception:
        phys = 64 * _MIB                      # conservative (v7x-sized) fallback
    return max(phys - 8 * _MIB, 16 * _MIB)


# ----------------------------------------------------------------------------- kernels
def _mlp_resident_kernel(x_ref, w1_ref, b1_ref, w2_ref, b2_ref, o_ref):
    # Weight-resident path: full W1/W2 stay in VMEM across all row tiles
    # (constant block index -> fetched from HBM exactly once per call).
    x = x_ref[...].astype(jnp.bfloat16)                       # cast in-kernel
    h = jnp.dot(x, w1_ref[...], preferred_element_type=jnp.float32)
    h = jnp.maximum(h + b1_ref[...], 0.0)
    o_ref[...] = (jnp.dot(h.astype(w2_ref.dtype), w2_ref[...],
                          preferred_element_type=jnp.float32)
                  + b2_ref[...]).astype(o_ref.dtype)


def _mlp_htiled_kernel(x_ref, w1_ref, b1_ref, w2_ref, b2_ref, o_ref):
    # Streaming path: hidden dim tiled on the last (reduction) grid axis.
    # The output block index is constant along that axis, so o_ref itself is the
    # VMEM-resident f32 accumulator (no scratch, no final copy).
    h_idx = pl.program_id(1)

    @pl.when(h_idx == 0)
    def _():
        o_ref[...] = jnp.broadcast_to(b2_ref[...], o_ref.shape)

    x = x_ref[...].astype(jnp.bfloat16)                       # cast in-kernel
    h = jnp.dot(x, w1_ref[...], preferred_element_type=jnp.float32)
    h = jnp.maximum(h + b1_ref[...], 0.0)
    o_ref[...] += jnp.dot(h.astype(w2_ref.dtype), w2_ref[...],
                          preferred_element_type=jnp.float32)


# ----------------------------------------------------------------------------- pallas_call wrappers
def _call_resident(x2d, w1, b1, w2, b2, tm, vmem_limit):
    M, Din = x2d.shape
    H = w1.shape[1]
    Dout = w2.shape[1]
    assert Dout % 128 == 0 and tm % 8 == 0
    n_row = pl.cdiv(M, tm)
    cost = pl.CostEstimate(
        flops=2 * M * H * (Din + Dout),
        transcendentals=0,
        bytes_accessed=M * Din * 4 + (Din * H + H * Dout) * 2
        + (H + Dout) * 4 + M * Dout * 4,
    )
    return pl.pallas_call(
        _mlp_resident_kernel,
        out_shape=jax.ShapeDtypeStruct((M, Dout), jnp.float32),
        grid_spec=pltpu.PrefetchScalarGridSpec(
            num_scalar_prefetch=0,
            grid=(n_row,),
            in_specs=[
                pl.BlockSpec((tm, Din), lambda i: (i, 0)),    # x row tile (f32)
                pl.BlockSpec((Din, H), lambda i: (0, 0)),     # full W1 (resident)
                pl.BlockSpec((1, H), lambda i: (0, 0)),       # b1
                pl.BlockSpec((H, Dout), lambda i: (0, 0)),    # full W2 (resident)
                pl.BlockSpec((1, Dout), lambda i: (0, 0)),    # b2
            ],
            out_specs=pl.BlockSpec((tm, Dout), lambda i: (i, 0)),
        ),
        compiler_params=pltpu.CompilerParams(
            dimension_semantics=("parallel",),
            vmem_limit_bytes=vmem_limit,
        ),
        cost_estimate=cost,
    )(x2d, w1, b1, w2, b2)


def _call_htiled(x2d, w1, b1, w2, b2, tm, vmem_limit):
    M, Din = x2d.shape
    H = w1.shape[1]
    Dout = w2.shape[1]
    assert H % _TH == 0 and Dout % 128 == 0 and tm % 8 == 0
    n_row = pl.cdiv(M, tm)
    cost = pl.CostEstimate(
        flops=2 * M * H * (Din + Dout),
        transcendentals=0,
        bytes_accessed=M * Din * 4 + n_row * (Din * H + H * Dout) * 2
        + (H + Dout) * 4 + M * Dout * 4,
    )
    return pl.pallas_call(
        _mlp_htiled_kernel,
        out_shape=jax.ShapeDtypeStruct((M, Dout), jnp.float32),
        grid_spec=pltpu.PrefetchScalarGridSpec(
            num_scalar_prefetch=0,
            grid=(n_row, H // _TH),
            in_specs=[
                pl.BlockSpec((tm, Din), lambda i, h: (i, 0)),   # x tile (const over h)
                pl.BlockSpec((Din, _TH), lambda i, h: (0, h)),  # W1 hidden slice
                pl.BlockSpec((1, _TH), lambda i, h: (0, h)),    # b1 hidden slice
                pl.BlockSpec((_TH, Dout), lambda i, h: (h, 0)), # W2 hidden slice
                pl.BlockSpec((1, Dout), lambda i, h: (0, 0)),   # b2 (constant)
            ],
            out_specs=pl.BlockSpec((tm, Dout), lambda i, h: (i, 0)),
        ),
        compiler_params=pltpu.CompilerParams(
            dimension_semantics=("parallel", "arbitrary"),
            vmem_limit_bytes=vmem_limit,
        ),
        cost_estimate=cost,
    )(x2d, w1, b1, w2, b2)


# ----------------------------------------------------------------------------- tile / path selection
def _fit_resident(tm, Din, Dout, H):
    # Double-buffered estimate (weights counted x2 conservatively even though
    # their constant block index means they're only DMA'd once).
    return (2 * tm * Din * 4          # x tile, f32 in HBM
            + 2 * Din * H * 2         # full W1, bf16
            + 2 * H * Dout * 2        # full W2, bf16
            + 2 * tm * Dout * 4       # output tile, f32
            + 2 * (H + Dout) * 8 * 4) # biases (sublane-padded)


def _fit_htiled(tm, Din, Dout, H):
    return (2 * tm * Din * 4
            + 2 * Din * _TH * 2
            + 2 * _TH * Dout * 2
            + 2 * tm * Dout * 4       # output tile doubles as the accumulator
            + 2 * (_TH + Dout) * 8 * 4)


def _pick_path(M, Din, Dout, H, budget):
    """Pick ('resident'|'htiled', tm). tm is never shrunk to manufacture extra
    row blocks (single-TC chips gain nothing; on v7x splitting a mem-bound
    kernel only re-streams weights)."""
    tm_cap = min(1024, _round_up(M, 8))          # multiple of 8; >=16 when M allows
    cands = [t for t in _TM_CANDIDATES if t <= tm_cap]
    if not cands:
        cands = [tm_cap]
    elif cands[0] < tm_cap:
        cands = [tm_cap] + cands                 # e.g. M=300 -> try tm=304 first
    # Prefer the weight-resident path: weights hit HBM exactly once per call.
    for tm in cands:
        if tm >= min(tm_cap, 128) and _fit_resident(tm, Din, Dout, H) <= budget:
            return "resident", tm
    for tm in cands:
        if _fit_htiled(tm, Din, Dout, H) <= budget:
            return "htiled", tm
    return "htiled", 8                           # last resort (shouldn't happen)


# ----------------------------------------------------------------------------- module
class EncoderProjectorConcatPallas:
    """JAX/Pallas port of EncoderProjectorConcat (inference forward)."""

    HIDDEN = _HIDDEN

    def __init__(self, k, encoder_dim, llm_dim, key):
        self.k = k
        self.encoder_dim = encoder_dim
        self.llm_dim = llm_dim
        in_dim = encoder_dim * k
        out_pad = (-llm_dim) % 128               # lane-dense output slab
        self.dout_padded = llm_dim + out_pad

        k1, k2, k3, k4 = jax.random.split(key, 4)
        # PyTorch stores W as [out, in]; we keep [in, out].  Weights live in bf16
        # (fast MXU path + half the HBM/VMEM traffic); biases stay f32.
        s1 = 1.0 / jnp.sqrt(in_dim)
        s2 = 1.0 / jnp.sqrt(self.HIDDEN)
        w1 = jax.random.uniform(k1, (in_dim, self.HIDDEN), jnp.float32, -s1, s1)
        b1 = jax.random.uniform(k2, (1, self.HIDDEN), jnp.float32, -s1, s1)
        w2 = jax.random.uniform(k3, (self.HIDDEN, llm_dim), jnp.float32, -s2, s2)
        b2 = jax.random.uniform(k4, (1, llm_dim), jnp.float32, -s2, s2)
        if out_pad:
            w2 = jnp.pad(w2, ((0, 0), (0, out_pad)))
            b2 = jnp.pad(b2, ((0, 0), (0, out_pad)))
        self.w1 = w1.astype(jnp.bfloat16)
        self.b1 = b1
        self.w2 = w2.astype(jnp.bfloat16)
        self.b2 = b2
        self.saved_speech_embeddings = None

    def __call__(self, x):
        # x: [B, T, D_enc]
        B, T, D = x.shape
        k = self.k
        n_discard = T % k
        if n_discard > 0:
            x = x[:, : T - n_discard, :]
        Tp = x.shape[1] // k
        x = x.reshape(B, Tp, D * k)              # concat k frames per step
        # TODO(synk): PyTorch does `.detach().cpu()`; we keep the array on device
        # to avoid a blocking device->host sync in the forward path.
        self.saved_speech_embeddings = x

        M = B * Tp
        Din = D * k
        x2d = x.reshape(M, Din)                  # stays f32; cast to bf16 in-kernel

        budget = _vmem_budget_bytes()
        path, tm = _pick_path(M, Din, self.dout_padded, self.HIDDEN, budget)
        if path == "resident":
            out2d = _call_resident(x2d, self.w1, self.b1, self.w2, self.b2,
                                   tm, budget)
        else:
            out2d = _call_htiled(x2d, self.w1, self.b1, self.w2, self.b2,
                                 tm, budget)
        out2d = out2d[:, : self.llm_dim]         # drop lane padding
        return out2d.reshape(B, Tp, self.llm_dim)


if __name__ == "__main__":
    key = jax.random.PRNGKey(0)
    kx, kp = jax.random.split(key)

    # Small config: k=4, encoder_dim=32 -> in_dim=128, llm_dim=64 (padded to 128).
    k_rate, enc_dim, llm_dim = 4, 32, 64
    B, T = 2, 18  # 18 % 4 == 2 frames discarded -> T' = 4 per batch
    x = jax.random.normal(kx, (B, T, enc_dim), jnp.float32)

    proj = EncoderProjectorConcatPallas(k_rate, enc_dim, llm_dim, kp)
    out = jax.block_until_ready(proj(x))

    # Pure-JAX reference using the same bf16 operands / f32 accumulation.
    Tt = T - (T % k_rate)
    xt = x[:, :Tt, :].reshape(B, Tt // k_rate, enc_dim * k_rate)
    h = jnp.maximum(
        jnp.dot(xt.astype(jnp.bfloat16), proj.w1,
                preferred_element_type=jnp.float32) + proj.b1, 0.0)
    ref = jnp.dot(h.astype(jnp.bfloat16), proj.w2,
                  preferred_element_type=jnp.float32) + proj.b2
    ref = ref[..., :llm_dim]

    assert out.shape == (B, Tt // k_rate, llm_dim)
    assert jnp.allclose(out, ref, atol=2e-2, rtol=2e-2), \
        float(jnp.max(jnp.abs(out - ref)))

    print("KERNEL_OK")
</pallas_src>

<mosaic_0001>
module attributes {stable_mosaic.version = 11 : i64} {
  func.func @_mlp_resident_kernel(%arg0: i32, %arg1: memref<8x128xf32, #tpu.memory_space<vmem>>, %arg2: memref<128x2048xbf16, #tpu.memory_space<vmem>>, %arg3: memref<1x2048xf32, #tpu.memory_space<vmem>>, %arg4: memref<2048x128xbf16, #tpu.memory_space<vmem>>, %arg5: memref<1x128xf32, #tpu.memory_space<vmem>>, %arg6: memref<8x128xf32, #tpu.memory_space<vmem>>) attributes {dimension_semantics = [#tpu.dimension_semantics<parallel>], iteration_bounds = array<i64: 1>, scalar_prefetch = 0 : i64, scratch_operands = 0 : i64, tpu.core_type = #tpu.core_type<tc>, window_params = [{transform_indices = @transform_0, window_bounds = array<i64: 8, 128>}, {pipeline_mode = #tpu.pipeline_mode<synchronous>, transform_indices = @transform_1, window_bounds = array<i64: 128, 2048>}, {pipeline_mode = #tpu.pipeline_mode<synchronous>, transform_indices = @transform_2, window_bounds = array<i64: 1, 2048>}, {pipeline_mode = #tpu.pipeline_mode<synchronous>, transform_indices = @transform_3, window_bounds = array<i64: 2048, 128>}, {pipeline_mode = #tpu.pipeline_mode<synchronous>, transform_indices = @transform_4, window_bounds = array<i64: 1, 128>}, {transform_indices = @transform_5, window_bounds = array<i64: 8, 128>}]} {
    %c0 = arith.constant 0 : index
    %c0_0 = arith.constant 0 : index
    %0 = vector.load %arg1[%c0, %c0_0] : memref<8x128xf32, #tpu.memory_space<vmem>>, vector<8x128xf32>
    %1 = arith.truncf %0 : vector<8x128xf32> to vector<8x128xbf16>
    %c0_1 = arith.constant 0 : index
    %c0_2 = arith.constant 0 : index
    %2 = vector.load %arg2[%c0_1, %c0_2] : memref<128x2048xbf16, #tpu.memory_space<vmem>>, vector<128x2048xbf16>
    %cst = arith.constant dense<0.000000e+00> : vector<8x2048xf32>
    %3 = tpu.matmul %1, %2, %cst {dimension_numbers = #tpu.dot_dimension_numbers<[1], [0], [0], [1], [0, 0, 1, 1], [], []>} : vector<8x128xbf16>, vector<128x2048xbf16>, vector<8x2048xf32> -> vector<8x2048xf32>
    %c0_3 = arith.constant 0 : index
    %c0_4 = arith.constant 0 : index
    %4 = vector.load %arg3[%c0_3, %c0_4] : memref<1x2048xf32, #tpu.memory_space<vmem>>, vector<1x2048xf32>
    %5 = vector.broadcast %4 : vector<1x2048xf32> to vector<8x2048xf32>
    %6 = arith.addf %3, %5 : vector<8x2048xf32>
    %cst_5 = arith.constant 0.000000e+00 : f32
    %7 = vector.broadcast %cst_5 : f32 to vector<8x2048xf32>
    %8 = arith.maximumf %6, %7 : vector<8x2048xf32>
    %9 = arith.truncf %8 : vector<8x2048xf32> to vector<8x2048xbf16>
    %c0_6 = arith.constant 0 : index
    %c0_7 = arith.constant 0 : index
    %10 = vector.load %arg4[%c0_6, %c0_7] : memref<2048x128xbf16, #tpu.memory_space<vmem>>, vector<2048x128xbf16>
    %cst_8 = arith.constant dense<0.000000e+00> : vector<8x128xf32>
    %11 = tpu.matmul %9, %10, %cst_8 {dimension_numbers = #tpu.dot_dimension_numbers<[1], [0], [0], [1], [0, 0, 1, 1], [], []>} : vector<8x2048xbf16>, vector<2048x128xbf16>, vector<8x128xf32> -> vector<8x128xf32>
    %c0_9 = arith.constant 0 : index
    %c0_10 = arith.constant 0 : index
    %12 = vector.load %arg5[%c0_9, %c0_10] : memref<1x128xf32, #tpu.memory_space<vmem>>, vector<1x128xf32>
    %13 = vector.broadcast %12 : vector<1x128xf32> to vector<8x128xf32>
    %14 = arith.addf %11, %13 : vector<8x128xf32>
    %c0_11 = arith.constant 0 : index
    %c0_12 = arith.constant 0 : index
    %15 = vector.load %arg6[%c0_11, %c0_12] : memref<8x128xf32, #tpu.memory_space<vmem>>, vector<8x128xf32>
    tpu.vector_store %arg6[%c0_11, %c0_12], %14 {strides = array<i32>} : memref<8x128xf32, #tpu.memory_space<vmem>>, vector<8x128xf32>,
    return
  }
  func.func @transform_0(%arg0: i32) -> (i32, i32) {
    %c0_i32 = arith.constant 0 : i32
    %c0_i32_0 = arith.constant 0 : i32
    return %arg0, %c0_i32 : i32, i32
  }
  func.func @transform_1(%arg0: i32) -> (i32, i32) {
    %c0_i32 = arith.constant 0 : i32
    %c0_i32_0 = arith.constant 0 : i32
    %c0_i32_1 = arith.constant 0 : i32
    return %c0_i32, %c0_i32_0 : i32, i32
  }
  func.func @transform_2(%arg0: i32) -> (i32, i32) {
    %c0_i32 = arith.constant 0 : i32
    %c0_i32_0 = arith.constant 0 : i32
    %c0_i32_1 = arith.constant 0 : i32
    return %c0_i32, %c0_i32_0 : i32, i32
  }
  func.func @transform_3(%arg0: i32) -> (i32, i32) {
    %c0_i32 = arith.constant 0 : i32
    %c0_i32_0 = arith.constant 0 : i32
    %c0_i32_1 = arith.constant 0 : i32
    return %c0_i32, %c0_i32_0 : i32, i32
  }
  func.func @transform_4(%arg0: i32) -> (i32, i32) {
    %c0_i32 = arith.constant 0 : i32
    %c0_i32_0 = arith.constant 0 : i32
    %c0_i32_1 = arith.constant 0 : i32
    return %c0_i32, %c0_i32_0 : i32, i32
  }
  func.func @transform_5(%arg0: i32) -> (i32, i32) {
    %c0_i32 = arith.constant 0 : i32
    %c0_i32_0 = arith.constant 0 : i32
    return %arg0, %c0_i32 : i32, i32
  }
}

</mosaic_0001>

<bundles_post_ra>
// kernel: tpu_custom_call.1
= control target key start
LH: loop header
LB: loop body
LE: loop exit
PB: predicated region body
PF: predicated region fallthrough
CT: control target
= control target key end

     0   :  { %10 = vsyncpa [#allocation3], 0  ;;  %s3474_s0 = inlined_call_operand.hbm [shape: f32[8,128], index: 0, kind: input, shape index: {}]   ;;  %s3475_s1 = inlined_call_operand.hbm [shape: bf16[128,2048], index: 1, kind: input, shape index: {}]   ;;  %s3476_s2 = inlined_call_operand.hbm [shape: f32[1,2048], index: 2, kind: input, shape index: {}]   ;;  %s3477_s3 = inlined_call_operand.hbm [shape: bf16[2048,128], index: 3, kind: input, shape index: {}]   ;;  %s3478_s4 = inlined_call_operand.vmem [shape: f32[1,128], index: 4, kind: input, shape index: {}]   ;;  %s3479_s5 = inlined_call_operand.hbm [shape: f32[8,128], index: 5, kind: output, shape index: {}]  }
   0x1   :  { %11 = vsyncpa [#allocation6], 0 }
   0x2   :  { %12 = vsyncpa [#allocation9], 0 }
   0x3   :  { %13 = vsyncpa [#allocation4], 0  ;;  %s3334_s18 = smov [#allocation5]  }
   0x4   :  { %s29_s19 = sshll.u32 %s3334_s18, 4  ;;  %s30_s19 = int_to_ptr.vmem [resolvable:$true] %s29_s19 }
   0x5   :  { %s3234_s20 = scalar_lea.vmem %s30_s19, 16384  ;;  %p3239_p1 = scmp.lt.s32.totalorder %s30_s19, %s30_s19 }
   0x6   :  { %p3235_p0 = scmp.ne.s32.totalorder %s30_s19, %s3234_s20  ;;  %p3240_p2 = scmp.lt.s32.totalorder %s3234_s20, %s3234_s20 }
   0x8   :  { %p3241_p3 = por %p3240_p2, %p3239_p1 }
   0xa   :  { %p3242_p4 = pnand %p3241_p3, %p3235_p0 }
   0xc   :  { %3245 = shalt.err (!%p3242_p4)
}
   0xd   :  { %s3335_s21 = smov 1024   ;;  %s3336_s22 = smov 64  }
   0xe   :  { %35 = dma.hbm_to_vmem [thread:$0]  %s3475_s1, 16384, %s30_s19, [#allocation6], %s3335_s21, %s3335_s21, %s3336_s22  }
   0xf   :  { %s3337_s25 = smov [#allocation2]   ;;  %s3338_s27 = smov [#allocation7]  }
  0x10   :  { %s20_s26 = sshll.u32 %s3337_s25, 4  ;;  %s42_s28 = sshll.u32 %s3338_s27, 4  ;;  %s21_s26 = int_to_ptr.vmem [resolvable:$true] %s20_s26  ;;  %s43_s28 = int_to_ptr.vmem [resolvable:$true] %s42_s28 }
  0x11   :  { %s3254_s29 = scalar_lea.vmem %s21_s26, 128  ;;  %p3259_p6 = scmp.lt.s32.totalorder %s21_s26, %s21_s26 }
  0x12   :  { %p3255_p5 = scmp.ne.s32.totalorder %s21_s26, %s3254_s29  ;;  %p3260_p7 = scmp.lt.s32.totalorder %s3254_s29, %s3254_s29 }
  0x14   :  { %p3261_p8 = por %p3260_p7, %p3259_p6 }
  0x16   :  { %p3262_p9 = pnand %p3261_p8, %p3255_p5 }
  0x18   :  { %3265 = shalt.err (!%p3262_p9)
}
  0x19   :  { %23 = dma.hbm_to_vmem [thread:$0]  %s3474_s0, 128, %s21_s26, [#allocation3]  }
  0x1a   :  { %s3274_s7 = scalar_lea.vmem %s43_s28, 256  ;;  %p3279_p11 = scmp.lt.s32.totalorder %s43_s28, %s43_s28 }
  0x1b   :  { %p3275_p10 = scmp.ne.s32.totalorder %s43_s28, %s3274_s7  ;;  %p3280_p12 = scmp.lt.s32.totalorder %s3274_s7, %s3274_s7 }
  0x1d   :  { %p3281_p13 = por %p3280_p12, %p3279_p11 }
  0x1f   :  { %p3282_p0 = pnand %p3281_p13, %p3275_p10 }
  0x21   :  { %3285 = shalt.err (!%p3282_p0)
}
  0x22   :  { %45 = dma.hbm_to_vmem [thread:$0]  %s3476_s2, 256, %s43_s28, [#allocation6]  }
  0x23   :  { %s3339_s9 = smov [#allocation8]  }
  0x24   :  { %s51_s10 = sshll.u32 %s3339_s9, 4  ;;  %s52_s10 = int_to_ptr.vmem [resolvable:$true] %s51_s10 }
  0x25   :  { %s3294_s11 = scalar_lea.vmem %s52_s10, 16384  ;;  %p3299_p2 = scmp.lt.s32.totalorder %s52_s10, %s52_s10 }
  0x26   :  { %p3295_p1 = scmp.ne.s32.totalorder %s52_s10, %s3294_s11  ;;  %p3300_p3 = scmp.lt.s32.totalorder %s3294_s11, %s3294_s11 }
  0x28   :  { %p3301_p4 = por %p3300_p3, %p3299_p2 }
  0x2a   :  { %p3302_p5 = pnand %p3301_p4, %p3295_p1 }
  0x2c   :  { %3305 = shalt.err (!%p3302_p5)
}
  0x2d   :  { %s3340_s0 = smov 4  }
  0x2e   :  { %57 = dma.hbm_to_vmem [thread:$0]  %s3477_s3, 16384, %s52_s10, [#allocation9], %s3336_s22, %s3336_s22, %s3340_s0  }
  0x2f   :  { %3326 = dma.done.wait [#allocation3], 128  }
  0x30   :  { %3327 = vsyncadd [#allocation3], 4294967168 }
  0x31   :  { %3328 = dma.done.wait [#allocation6], 16640  }
  0x32   :  { %3329 = vsyncadd [#allocation6], 4294950656 }
  0x33   :  { %3330 = dma.done.wait [#allocation9], 16384  }
  0x34   :  { %3331 = vsyncadd [#allocation9], 4294950912  ;;  %v3341_v0 = vmov 0   ;;  %v187_v1 = vld [vmem:[#allocation5 + $0x380] sm:$0xff]  ;;  %v188_v3 = vld [vmem:[#allocation5 + $0x388] sm:$0xff] }
  0x35   :  { %959 = vmatprep.mubr.bf16.mxu0 %v3341_v0  ;;  %1000 = vmatprep.mubr.bf16.mxu1 %v3341_v0  ;;  %v195_v2 = vld [vmem:[#allocation5 + $0x3c0] sm:$0xff]  ;;  %v196_v5 = vld [vmem:[#allocation5 + $0x3c8] sm:$0xff]  ;;  %v189_v63 = vld [vmem:[#allocation5 + $0x390] sm:$0xff] }
  0x36   :  { %v2769_v4 = vcombine.high %v187_v1, %v195_v2  ;;  %v2768_v6 = vcombine.low %v187_v1, %v195_v2  ;;  %v171_v7 = vld [vmem:[#allocation5 + $0x300] sm:$0xff]  ;;  %v2771_v9 = vcombine.high %v188_v3, %v196_v5  ;;  %v2770_v10 = vcombine.low %v188_v3, %v196_v5  ;;  %v172_v12 = vld [vmem:[#allocation5 + $0x308] sm:$0xff]  ;;  %v197_v1 = vld [vmem:[#allocation5 + $0x3d0] sm:$0xff] }
  0x37   :  { %v179_v8 = vld [vmem:[#allocation5 + $0x340] sm:$0xff]  ;;  %v180_v13 = vld [vmem:[#allocation5 + $0x348] sm:$0xff]  ;;  %v190_v2 = vld [vmem:[#allocation5 + $0x398] sm:$0xff] }
  0x38   :  { %v2753_v11 = vcombine.high %v171_v7, %v179_v8  ;;  %v155_v14 = vld [vmem:[#allocation5 + $0x280] sm:$0xff]  ;;  %927 = vmatprep.subr.bf16.mxu0 %v2769_v4  ;;  %v2755_v15 = vcombine.high %v172_v12, %v180_v13  ;;  %v156_v17 = vld [vmem:[#allocation5 + $0x288] sm:$0xff]  ;;  %968 = vmatprep.subr.bf16.mxu1 %v2771_v9  ;;  %v2752_v19 = vcombine.low %v171_v7, %v179_v8  ;;  %v198_v3 = vld [vmem:[#allocation5 + $0x3d8] sm:$0xff] }
  0x39   :  { %v163_v16 = vld [vmem:[#allocation5 + $0x2c0] sm:$0xff]  ;;  %v164_v18 = vld [vmem:[#allocation5 + $0x2c8] sm:$0xff]  ;;  %928 = vmatpush1.bf16.msra.mxu0 %v2768_v6  ;;  %969 = vmatpush1.bf16.msra.mxu1 %v2770_v10  ;;  %v2754_v20 = vcombine.low %v172_v12, %v180_v13  ;;  %v73_v5 = vld [vmem:[#allocation2] sm:$0xff]  ;;  %v2773_v7 = vcombine.high %v189_v63, %v197_v1  ;;  %v2775_v8 = vcombine.high %v190_v2, %v198_v3 }
  0x3a   :  { %929 = vmatprep.subr.bf16.mxu0 %v2753_v11  ;;  %v2737_v21 = vcombine.high %v155_v14, %v163_v16  ;;  %970 = vmatprep.subr.bf16.mxu1 %v2755_v15  ;;  %v2739_v22 = vcombine.high %v156_v17, %v164_v18  ;;  %v139_v23 = vld [vmem:[#allocation5 + $0x200] sm:$0xff]  ;;  %v140_v25 = vld [vmem:[#allocation5 + $0x208] sm:$0xff]  ;;  %v2736_v27 = vcombine.low %v155_v14, %v163_v16  ;;  %v173_v9 = vld [vmem:[#allocation5 + $0x310] sm:$0xff] }
  0x3b   :  { %v147_v24 = vld [vmem:[#allocation5 + $0x240] sm:$0xff]  ;;  %v148_v26 = vld [vmem:[#allocation5 + $0x248] sm:$0xff]  ;;  %v2738_v28 = vcombine.low %v156_v17, %v164_v18  ;;  %v181_v10 = vld [vmem:[#allocation5 + $0x350] sm:$0xff]  ;;  %v3390_v11 = vpack.c.bf16 %v73_v5, %v73_v5  ;;  %v2772_v14 = vcombine.low %v189_v63, %v197_v1  ;;  %v2774_v15 = vcombine.low %v190_v2, %v198_v3 }
  0x3c   :  { %v2721_v29 = vcombine.high %v139_v23, %v147_v24  ;;  %v2723_v30 = vcombine.high %v140_v25, %v148_v26  ;;  %v123_v31 = vld [vmem:[#allocation5 + $0x180] sm:$0xff]  ;;  %v124_v33 = vld [vmem:[#allocation5 + $0x188] sm:$0xff]  ;;  %v2720_v35 = vcombine.low %v139_v23, %v147_v24  ;;  %v2722_v36 = vcombine.low %v140_v25, %v148_v26  ;;  %v174_v12 = vld [vmem:[#allocation5 + $0x318] sm:$0xff] }
  0x3d   :  { %930 = vmatpush1.bf16.msra.mxu0 %v2752_v19  ;;  %971 = vmatpush1.bf16.msra.mxu1 %v2754_v20  ;;  %v131_v32 = vld [vmem:[#allocation5 + $0x1c0] sm:$0xff]  ;;  %v132_v34 = vld [vmem:[#allocation5 + $0x1c8] sm:$0xff]  ;;  %v182_v13 = vld [vmem:[#allocation5 + $0x358] sm:$0xff]  ;;  %v2757_v16 = vcombine.high %v173_v9, %v181_v10 }
  0x3e   :  { %931 = vmatprep.subr.bf16.mxu0 %v2737_v21  ;;  %972 = vmatprep.subr.bf16.mxu1 %v2739_v22  ;;  %v2705_v37 = vcombine.high %v123_v31, %v131_v32  ;;  %v2707_v38 = vcombine.high %v124_v33, %v132_v34  ;;  %v107_v39 = vld [vmem:[#allocation5 + $0x100] sm:$0xff]  ;;  %v108_v41 = vld [vmem:[#allocation5 + $0x108] sm:$0xff]  ;;  %v2704_v43 = vcombine.low %v123_v31, %v131_v32  ;;  %v157_v18 = vld [vmem:[#allocation5 + $0x290] sm:$0xff] }
  0x3f   :  { %v115_v40 = vld [vmem:[#allocation5 + $0x140] sm:$0xff]  ;;  %v116_v42 = vld [vmem:[#allocation5 + $0x148] sm:$0xff]  ;;  %v2706_v44 = vcombine.low %v124_v33, %v132_v34  ;;  %v2759_v17 = vcombine.high %v174_v12, %v182_v13  ;;  %v165_v19 = vld [vmem:[#allocation5 + $0x2d0] sm:$0xff]  ;;  %v2756_v22 = vcombine.low %v173_v9, %v181_v10  ;;  %v2758_v23 = vcombine.low %v174_v12, %v182_v13 }
  0x40   :  { %v2689_v45 = vcombine.high %v107_v39, %v115_v40  ;;  %v2691_v46 = vcombine.high %v108_v41, %v116_v42  ;;  %v91_v47 = vld [vmem:[#allocation5 + $0x80] sm:$0xff]  ;;  %v92_v49 = vld [vmem:[#allocation5 + $0x88] sm:$0xff]  ;;  %v2688_v51 = vcombine.low %v107_v39, %v115_v40  ;;  %v2690_v52 = vcombine.low %v108_v41, %v116_v42  ;;  %v158_v20 = vld [vmem:[#allocation5 + $0x298] sm:$0xff] }
  0x41   :  { %932 = vmatpush1.bf16.msra.mxu0 %v2736_v27  ;;  %973 = vmatpush1.bf16.msra.mxu1 %v2738_v28  ;;  %v99_v48 = vld [vmem:[#allocation5 + $0xc0] sm:$0xff]  ;;  %v100_v50 = vld [vmem:[#allocation5 + $0xc8] sm:$0xff]  ;;  %v166_v21 = vld [vmem:[#allocation5 + $0x2d8] sm:$0xff]  ;;  %v2741_v24 = vcombine.high %v157_v18, %v165_v19 }
  0x42   :  { %933 = vmatprep.subr.bf16.mxu0 %v2721_v29  ;;  %974 = vmatprep.subr.bf16.mxu1 %v2723_v30  ;;  %v2673_v53 = vcombine.high %v91_v47, %v99_v48  ;;  %v2675_v54 = vcombine.high %v92_v49, %v100_v50  ;;  %v75_v55 = vld [vmem:[#allocation5] sm:$0xff]  ;;  %v76_v57 = vld [vmem:[#allocation5 + $0x8] sm:$0xff]  ;;  %v2672_v59 = vcombine.low %v91_v47, %v99_v48  ;;  %v141_v26 = vld [vmem:[#allocation5 + $0x210] sm:$0xff] }
  0x43   :  { %v83_v56 = vld [vmem:[#allocation5 + $0x40] sm:$0xff]  ;;  %v84_v58 = vld [vmem:[#allocation5 + $0x48] sm:$0xff]  ;;  %v2674_v60 = vcombine.low %v92_v49, %v100_v50  ;;  %v2743_v25 = vcombine.high %v158_v20, %v166_v21  ;;  %v149_v27 = vld [vmem:[#allocation5 + $0x250] sm:$0xff]  ;;  %v2740_v30 = vcombine.low %v157_v18, %v165_v19  ;;  %v2742_v31 = vcombine.low %v158_v20, %v166_v21 }
  0x44   :  { %v2657_v61 = vcombine.high %v75_v55, %v83_v56  ;;  %v2659_v62 = vcombine.high %v76_v57, %v84_v58  ;;  %v2656_v4 = vcombine.low %v75_v55, %v83_v56  ;;  %v2658_v6 = vcombine.low %v76_v57, %v84_v58  ;;  %v142_v28 = vld [vmem:[#allocation5 + $0x218] sm:$0xff]  ;;  %v125_v34 = vld [vmem:[#allocation5 + $0x190] sm:$0xff]  ;;  %v191_v63 = vld [vmem:[#allocation5 + $0x3a0] sm:$0xff] }
  0x45   :  { %934 = vmatpush1.bf16.msra.mxu0 %v2720_v35  ;;  %975 = vmatpush1.bf16.msra.mxu1 %v2722_v36  ;;  %v150_v29 = vld [vmem:[#allocation5 + $0x258] sm:$0xff]  ;;  %v2725_v32 = vcombine.high %v141_v26, %v149_v27  ;;  %v133_v35 = vld [vmem:[#allocation5 + $0x1d0] sm:$0xff]  ;;  %v199_v3 = vld [vmem:[#allocation5 + $0x3e0] sm:$0xff] }
  0x46   :  { %935 = vmatprep.subr.bf16.mxu0 %v2705_v37  ;;  %976 = vmatprep.subr.bf16.mxu1 %v2707_v38  ;;  %v2727_v33 = vcombine.high %v142_v28, %v150_v29  ;;  %v126_v36 = vld [vmem:[#allocation5 + $0x198] sm:$0xff]  ;;  %v2724_v38 = vcombine.low %v141_v26, %v149_v27  ;;  %v109_v39 = vld [vmem:[#allocation5 + $0x110] sm:$0xff]  ;;  %v2726_v40 = vcombine.low %v142_v28, %v150_v29  ;;  %v192_v5 = vld [vmem:[#allocation5 + $0x3a8] sm:$0xff] }
  0x47   :  { %v134_v37 = vld [vmem:[#allocation5 + $0x1d8] sm:$0xff]  ;;  %v2709_v41 = vcombine.high %v125_v34, %v133_v35  ;;  %v117_v42 = vld [vmem:[#allocation5 + $0x150] sm:$0xff]  ;;  %v2777_v10 = vcombine.high %v191_v63, %v199_v3  ;;  %v183_v12 = vld [vmem:[#allocation5 + $0x360] sm:$0xff] }
  0x48   :  { %v93_v47 = vld [vmem:[#allocation5 + $0x90] sm:$0xff]  ;;  %v2710_v48 = vcombine.low %v126_v36, %v134_v37  ;;  %v2693_v49 = vcombine.high %v109_v39, %v117_v42  ;;  %v167_v20 = vld [vmem:[#allocation5 + $0x2e0] sm:$0xff]  ;;  %v144_v29 = vld [vmem:[#allocation5 + $0x228] sm:$0xff] }
  0x49   :  { %936 = vmatpush1.bf16.msra.mxu0 %v2704_v43  ;;  %977 = vmatpush1.bf16.msra.mxu1 %v2706_v44  ;;  %v2711_v43 = vcombine.high %v126_v36, %v134_v37  ;;  %v110_v44 = vld [vmem:[#allocation5 + $0x118] sm:$0xff]  ;;  %v101_v50 = vld [vmem:[#allocation5 + $0xd0] sm:$0xff]  ;;  %v151_v26 = vld [vmem:[#allocation5 + $0x260] sm:$0xff] }
  0x4a   :  { %937 = vmatprep.subr.bf16.mxu0 %v2689_v45  ;;  %978 = vmatprep.subr.bf16.mxu1 %v2691_v46  ;;  %v118_v45 = vld [vmem:[#allocation5 + $0x158] sm:$0xff]  ;;  %v2708_v46 = vcombine.low %v125_v34, %v133_v35  ;;  %v77_v55 = vld [vmem:[#allocation5 + $0x10] sm:$0xff]  ;;  %v2677_v57 = vcombine.high %v93_v47, %v101_v50  ;;  %v135_v34 = vld [vmem:[#allocation5 + $0x1e0] sm:$0xff] }
  0x4b   :  { %v2694_v56 = vcombine.low %v110_v44, %v118_v45  ;;  %v85_v58 = vld [vmem:[#allocation5 + $0x50] sm:$0xff]  ;;  %v128_v37 = vld [vmem:[#allocation5 + $0x1a8] sm:$0xff] }
  0x4c   :  { %v2661_v2 = vcombine.high %v77_v55, %v85_v58 }
  0x4d   :  { %938 = vmatpush1.bf16.msra.mxu0 %v2688_v51  ;;  %979 = vmatpush1.bf16.msra.mxu1 %v2690_v52  ;;  %v2695_v51 = vcombine.high %v110_v44, %v118_v45  ;;  %v94_v52 = vld [vmem:[#allocation5 + $0x98] sm:$0xff]  ;;  %v112_v45 = vld [vmem:[#allocation5 + $0x128] sm:$0xff] }
  0x4e   :  { %939 = vmatprep.subr.bf16.mxu0 %v2673_v53  ;;  %980 = vmatprep.subr.bf16.mxu1 %v2675_v54  ;;  %v102_v53 = vld [vmem:[#allocation5 + $0xd8] sm:$0xff]  ;;  %v2692_v54 = vcombine.low %v109_v39, %v117_v42  ;;  %v119_v42 = vld [vmem:[#allocation5 + $0x160] sm:$0xff] }
  0x4f   :  { %v2678_v1 = vcombine.low %v94_v52, %v102_v53 }
  0x51   :  { %940 = vmatpush1.bf16.msra.mxu0 %v2672_v59  ;;  %981 = vmatpush1.bf16.msra.mxu1 %v2674_v60  ;;  %v2679_v59 = vcombine.high %v94_v52, %v102_v53  ;;  %v78_v60 = vld [vmem:[#allocation5 + $0x18] sm:$0xff]  ;;  %v96_v53 = vld [vmem:[#allocation5 + $0xa8] sm:$0xff] }
  0x52   :  { %941 = vmatprep.subr.bf16.mxu0 %v2657_v61  ;;  %982 = vmatprep.subr.bf16.mxu1 %v2659_v62  ;;  %v86_v61 = vld [vmem:[#allocation5 + $0x58] sm:$0xff]  ;;  %v2676_v62 = vcombine.low %v93_v47, %v101_v50  ;;  %v103_v50 = vld [vmem:[#allocation5 + $0xe0] sm:$0xff] }
  0x53   :  { %v2662_v9 = vcombine.low %v78_v60, %v86_v61 }
  0x55   :  { %942 = vmatpush1.bf16.msra.mxu0 %v2656_v4  ;;  %983 = vmatpush1.bf16.msra.mxu1 %v2658_v6  ;;  %v2663_v4 = vcombine.high %v78_v60, %v86_v61  ;;  %v200_v6 = vld [vmem:[#allocation5 + $0x3e8] sm:$0xff] }
  0x56   :  { %1009 = vmatprep.subr.bf16.mxu0 %v2773_v7  ;;  %1050 = vmatprep.subr.bf16.mxu1 %v2775_v8  ;;  %v2660_v7 = vcombine.low %v77_v55, %v85_v58  ;;  %v175_v8 = vld [vmem:[#allocation5 + $0x320] sm:$0xff]  ;;  %v2779_v13 = vcombine.high %v192_v5, %v200_v6  ;;  %v2778_v18 = vcombine.low %v192_v5, %v200_v6  ;;  %v80_v61 = vld [vmem:[#allocation5 + $0x28] sm:$0xff]  ;;  %v194_v6 = vld [vmem:[#allocation5 + $0x3b8] sm:$0xff] }
  0x57   :  { %v2761_v19 = vcombine.high %v175_v8, %v183_v12  ;;  %v87_v58 = vld [vmem:[#allocation5 + $0x60] sm:$0xff] }
  0x58   :  { %960 = vmatmul.mubr.bf16.vlgmr.msra.gmra.mxu0 %v3390_v11  ;;  %1001 = vmatmul.mubr.bf16.vlgmr.msra.gmra.mxu1 %v3390_v11 }
  0x59   :  { %1010 = vmatpush1.bf16.msra.mxu0 %v2772_v14  ;;  %1051 = vmatpush1.bf16.msra.mxu1 %v2774_v15  ;;  %v176_v14 = vld [vmem:[#allocation5 + $0x328] sm:$0xff] }
  0x5a   :  { %1011 = vmatprep.subr.bf16.mxu0 %v2757_v16  ;;  %1052 = vmatprep.subr.bf16.mxu1 %v2759_v17  ;;  %v184_v15 = vld [vmem:[#allocation5 + $0x368] sm:$0xff]  ;;  %v2776_v16 = vcombine.low %v191_v63, %v199_v3  ;;  %v159_v17 = vld [vmem:[#allocation5 + $0x2a0] sm:$0xff]  ;;  %v201_v3 = vld [vmem:[#allocation5 + $0x3f0] sm:$0xff] }
  0x5b   :  { %1041 = vmatprep.mubr.bf16.mxu0 %v3341_v0  ;;  %1082 = vmatprep.mubr.bf16.mxu1 %v3341_v0  ;;  %v2763_v21 = vcombine.high %v176_v14, %v184_v15  ;;  %v2762_v27 = vcombine.low %v176_v14, %v184_v15  ;;  %v2745_v28 = vcombine.high %v159_v17, %v167_v20  ;;  %v178_v15 = vld [vmem:[#allocation5 + $0x338] sm:$0xff] }
  0x5d   :  { %1012 = vmatpush1.bf16.msra.mxu0 %v2756_v22  ;;  %1053 = vmatpush1.bf16.msra.mxu1 %v2758_v23  ;;  %v160_v22 = vld [vmem:[#allocation5 + $0x2a8] sm:$0xff] }
  0x5e   :  { %1013 = vmatprep.subr.bf16.mxu0 %v2741_v24  ;;  %1054 = vmatprep.subr.bf16.mxu1 %v2743_v25  ;;  %v168_v23 = vld [vmem:[#allocation5 + $0x2e8] sm:$0xff]  ;;  %v2760_v24 = vcombine.low %v175_v8, %v183_v12  ;;  %v143_v25 = vld [vmem:[#allocation5 + $0x220] sm:$0xff]  ;;  %v185_v12 = vld [vmem:[#allocation5 + $0x370] sm:$0xff] }
  0x5f   :  { %v2746_v35 = vcombine.low %v160_v22, %v168_v23  ;;  %v2729_v36 = vcombine.high %v143_v25, %v151_v26 }
  0x61   :  { %1014 = vmatpush1.bf16.msra.mxu0 %v2740_v30  ;;  %1055 = vmatpush1.bf16.msra.mxu1 %v2742_v31  ;;  %v152_v30 = vld [vmem:[#allocation5 + $0x268] sm:$0xff]  ;;  %v2747_v31 = vcombine.high %v160_v22, %v168_v23  ;;  %v162_v23 = vld [vmem:[#allocation5 + $0x2b8] sm:$0xff] }
  0x62   :  { %1015 = vmatprep.subr.bf16.mxu0 %v2725_v32  ;;  %1056 = vmatprep.subr.bf16.mxu1 %v2727_v33  ;;  %v2744_v32 = vcombine.low %v159_v17, %v167_v20  ;;  %v127_v33 = vld [vmem:[#allocation5 + $0x1a0] sm:$0xff]  ;;  %v2731_v39 = vcombine.high %v144_v29, %v152_v30  ;;  %v169_v20 = vld [vmem:[#allocation5 + $0x2f0] sm:$0xff] }
  0x63   :  { %v2713_v44 = vcombine.high %v127_v33, %v135_v34 }
  0x65   :  { %1016 = vmatpush1.bf16.msra.mxu0 %v2724_v38  ;;  %1057 = vmatpush1.bf16.msra.mxu1 %v2726_v40  ;;  %v136_v38 = vld [vmem:[#allocation5 + $0x1e8] sm:$0xff]  ;;  %v2728_v40 = vcombine.low %v143_v25, %v151_v26  ;;  %v170_v25 = vld [vmem:[#allocation5 + $0x2f8] sm:$0xff] }
  0x66   :  { %1017 = vmatprep.subr.bf16.mxu0 %v2709_v41  ;;  %1058 = vmatprep.subr.bf16.mxu1 %v2711_v43  ;;  %v111_v41 = vld [vmem:[#allocation5 + $0x120] sm:$0xff]  ;;  %v2730_v43 = vcombine.low %v144_v29, %v152_v30  ;;  %v2715_v47 = vcombine.high %v128_v37, %v136_v38 }
  0x67   :  { %v2697_v52 = vcombine.high %v111_v41, %v119_v42 }
  0x69   :  { %1018 = vmatpush1.bf16.msra.mxu0 %v2708_v46  ;;  %1059 = vmatpush1.bf16.msra.mxu1 %v2710_v48  ;;  %v120_v46 = vld [vmem:[#allocation5 + $0x168] sm:$0xff]  ;;  %v2712_v48 = vcombine.low %v127_v33, %v135_v34  ;;  %v2751_v33 = vcombine.high %v162_v23, %v170_v25 }
  0x6a   :  { %1019 = vmatprep.subr.bf16.mxu0 %v2693_v49  ;;  %1060 = vmatprep.subr.bf16.mxu1 %v2695_v51  ;;  %v95_v49 = vld [vmem:[#allocation5 + $0xa0] sm:$0xff]  ;;  %v2714_v51 = vcombine.low %v128_v37, %v136_v38  ;;  %v2699_v55 = vcombine.high %v112_v45, %v120_v46  ;;  %v2750_v37 = vcombine.low %v162_v23, %v170_v25  ;;  %v3112_v23 = vld [vmem:[#allocation8 + $0x20] sm:$0xff]   ;;  %v3115_v25 = vld [vmem:[#allocation8 + $0xd8] sm:$0xff]  }
  0x6b   :  { %v2681_v60 = vcombine.high %v95_v49, %v103_v50 }
  0x6d   :  { %1020 = vmatpush1.bf16.msra.mxu0 %v2692_v54  ;;  %1061 = vmatpush1.bf16.msra.mxu1 %v2694_v56  ;;  %v104_v54 = vld [vmem:[#allocation5 + $0xe8] sm:$0xff]  ;;  %v2696_v56 = vcombine.low %v111_v41, %v119_v42 }
  0x6e   :  { %1021 = vmatprep.subr.bf16.mxu0 %v2677_v57  ;;  %1062 = vmatprep.subr.bf16.mxu1 %v2679_v59  ;;  %v79_v57 = vld [vmem:[#allocation5 + $0x20] sm:$0xff]  ;;  %v2698_v59 = vcombine.low %v112_v45, %v120_v46  ;;  %v2683_v63 = vcombine.high %v96_v53, %v104_v54  ;;  %v113_v45 = vld [vmem:[#allocation5 + $0x130] sm:$0xff] }
  0x6f   :  { %v2665_v5 = vcombine.high %v79_v57, %v87_v58 }
  0x71   :  { %1022 = vmatpush1.bf16.msra.mxu0 %v2676_v62  ;;  %1063 = vmatpush1.bf16.msra.mxu1 %v2678_v1  ;;  %v88_v62 = vld [vmem:[#allocation5 + $0x68] sm:$0xff]  ;;  %v2680_v1 = vcombine.low %v95_v49, %v103_v50  ;;  %v97_v50 = vld [vmem:[#allocation5 + $0xb0] sm:$0xff] }
  0x72   :  { %1023 = vmatprep.subr.bf16.mxu0 %v2661_v2  ;;  %1064 = vmatprep.subr.bf16.mxu1 %v2663_v4  ;;  %v193_v2 = vld [vmem:[#allocation5 + $0x3b0] sm:$0xff]  ;;  %v2682_v4 = vcombine.low %v96_v53, %v104_v54  ;;  %v2667_v8 = vcombine.high %v80_v61, %v88_v62 }
  0x73   :  { %v2781_v14 = vcombine.high %v193_v2, %v201_v3  ;;  %v105_v53 = vld [vmem:[#allocation5 + $0xf0] sm:$0xff] }
  0x75   :  { %1024 = vmatpush1.bf16.msra.mxu0 %v2660_v7  ;;  %1065 = vmatpush1.bf16.msra.mxu1 %v2662_v9  ;;  %v202_v7 = vld [vmem:[#allocation5 + $0x3f8] sm:$0xff]  ;;  %v2664_v9 = vcombine.low %v79_v57, %v87_v58  ;;  %v81_v58 = vld [vmem:[#allocation5 + $0x30] sm:$0xff] }
  0x76   :  { %1091 = vmatprep.subr.bf16.mxu0 %v2777_v10  ;;  %1132 = vmatprep.subr.bf16.mxu1 %v2779_v13  ;;  %v177_v10 = vld [vmem:[#allocation5 + $0x330] sm:$0xff]  ;;  %v2666_v13 = vcombine.low %v80_v61, %v88_v62  ;;  %v2783_v17 = vcombine.high %v194_v6, %v202_v7 }
  0x77   :  { %v2765_v22 = vcombine.high %v177_v10, %v185_v12  ;;  %v2764_v26 = vcombine.low %v177_v10, %v185_v12  ;;  %v89_v61 = vld [vmem:[#allocation5 + $0x70] sm:$0xff]  ;;  %v3100_v10 = vld [vmem:[#allocation8 + $0x38] sm:$0xff]  }
  0x78   :  { %1042 = vmatmul.mubr.bf16.vlgmr.msra.gmra.mxu0 %v3390_v11  ;;  %1083 = vmatmul.mubr.bf16.vlgmr.msra.gmra.mxu1 %v3390_v11  ;;  %v3101_v12 = vld [vmem:[#allocation8 + $0xb8] sm:$0xff]  }
  0x79   :  { %1092 = vmatpush1.bf16.msra.mxu0 %v2776_v16  ;;  %1133 = vmatpush1.bf16.msra.mxu1 %v2778_v18  ;;  %v186_v16 = vld [vmem:[#allocation5 + $0x378] sm:$0xff]  ;;  %v2780_v18 = vcombine.low %v193_v2, %v201_v3  ;;  %v2684_v2 = vcombine.low %v97_v50, %v105_v53 }
  0x7a   :  { %1093 = vmatprep.subr.bf16.mxu0 %v2761_v19  ;;  %1134 = vmatprep.subr.bf16.mxu1 %v2763_v21  ;;  %v161_v19 = vld [vmem:[#allocation5 + $0x2b0] sm:$0xff]  ;;  %v2782_v21 = vcombine.low %v194_v6, %v202_v7  ;;  %v2766_v29 = vcombine.low %v178_v15, %v186_v16  ;;  %v2668_v6 = vcombine.low %v81_v58, %v89_v61  ;;  %v3098_v7 = vld [vmem:[#allocation8 + $0x78] sm:$0xff]  }
  0x7b   :  { %1123 = vmatprep.mubr.bf16.mxu0 %v3341_v0  ;;  %1164 = vmatprep.mubr.bf16.mxu1 %v3341_v0  ;;  %v2749_v30 = vcombine.high %v161_v19, %v169_v20  ;;  %v2748_v34 = vcombine.low %v161_v19, %v169_v20  ;;  %v3108_v19 = vld [vmem:[#allocation8 + $0x28] sm:$0xff]  }
  0x7c   :  { %v3109_v20 = vld [vmem:[#allocation8 + $0xa8] sm:$0xff]  }
  0x7d   :  { %1094 = vmatpush1.bf16.msra.mxu0 %v2760_v24  ;;  %1135 = vmatpush1.bf16.msra.mxu1 %v2762_v27  ;;  %v2767_v24 = vcombine.high %v178_v15, %v186_v16  ;;  %v145_v27 = vld [vmem:[#allocation5 + $0x230] sm:$0xff]  ;;  %v3104_v15 = vld [vmem:[#allocation8 + $0x30] sm:$0xff]  }
  0x7e   :  { %1095 = vmatprep.subr.bf16.mxu0 %v2745_v28  ;;  %1136 = vmatprep.subr.bf16.mxu1 %v2747_v31  ;;  %v153_v28 = vld [vmem:[#allocation5 + $0x270] sm:$0xff]  ;;  %v146_v31 = vld [vmem:[#allocation5 + $0x238] sm:$0xff]  ;;  %v3105_v16 = vld [vmem:[#allocation8 + $0xb0] sm:$0xff]  }
  0x7f   :  { %v2733_v38 = vcombine.high %v145_v27, %v153_v28  ;;  %v2732_v42 = vcombine.low %v145_v27, %v153_v28  ;;  %v3117_v27 = vld [vmem:[#allocation8 + $0x98] sm:$0xff]   ;;  %v3118_v28 = vld [vmem:[#allocation8 + $0x50] sm:$0xff]  }
  0x81   :  { %1096 = vmatpush1.bf16.msra.mxu0 %v2744_v32  ;;  %1137 = vmatpush1.bf16.msra.mxu1 %v2746_v35  ;;  %v154_v32 = vld [vmem:[#allocation5 + $0x278] sm:$0xff]  ;;  %v129_v35 = vld [vmem:[#allocation5 + $0x1b0] sm:$0xff] }
  0x82   :  { %1097 = vmatprep.subr.bf16.mxu0 %v2729_v36  ;;  %1138 = vmatprep.subr.bf16.mxu1 %v2731_v39  ;;  %v137_v36 = vld [vmem:[#allocation5 + $0x1f0] sm:$0xff]  ;;  %v130_v39 = vld [vmem:[#allocation5 + $0x1b8] sm:$0xff]  ;;  %v2735_v41 = vcombine.high %v146_v31, %v154_v32 }
  0x83   :  { %v2716_v49 = vcombine.low %v129_v35, %v137_v36 }
  0x85   :  { %1098 = vmatpush1.bf16.msra.mxu0 %v2728_v40  ;;  %1139 = vmatpush1.bf16.msra.mxu1 %v2730_v43  ;;  %v138_v40 = vld [vmem:[#allocation5 + $0x1f8] sm:$0xff]  ;;  %v2734_v43 = vcombine.low %v146_v31, %v154_v32  ;;  %v3121_v31 = vld [vmem:[#allocation8 + $0x90] sm:$0xff]  }
  0x86   :  { %1099 = vmatprep.subr.bf16.mxu0 %v2713_v44  ;;  %1140 = vmatprep.subr.bf16.mxu1 %v2715_v47  ;;  %v2717_v44 = vcombine.high %v129_v35, %v137_v36  ;;  %v2719_v46 = vcombine.high %v130_v39, %v138_v40  ;;  %v114_v47 = vld [vmem:[#allocation5 + $0x138] sm:$0xff]  ;;  %v3126_v36 = vld [vmem:[#allocation8 + $0x40] sm:$0xff]  }
  0x87   :  { %v3122_v32 = vld [vmem:[#allocation8 + $0x48] sm:$0xff]  }
  0x88   :  { %v3125_v35 = vld [vmem:[#allocation8 + $0x88] sm:$0xff]  }
  0x89   :  { %1100 = vmatpush1.bf16.msra.mxu0 %v2712_v48  ;;  %1141 = vmatpush1.bf16.msra.mxu1 %v2714_v51  ;;  %v122_v48 = vld [vmem:[#allocation5 + $0x178] sm:$0xff]  ;;  %v2718_v51 = vcombine.low %v130_v39, %v138_v40  ;;  %v3129_v39 = vld [vmem:[#allocation8 + $0x80] sm:$0xff]   ;;  %v3130_v40 = vld [vmem:[#allocation8 + $0x178] sm:$0xff]  }
  0x8a   :  { %1101 = vmatprep.subr.bf16.mxu0 %v2697_v52  ;;  %1142 = vmatprep.subr.bf16.mxu1 %v2699_v55  ;;  %v2703_v54 = vcombine.high %v114_v47, %v122_v48  ;;  %v98_v55 = vld [vmem:[#allocation5 + $0xb8] sm:$0xff] }
  0x8d   :  { %1102 = vmatpush1.bf16.msra.mxu0 %v2696_v56  ;;  %1143 = vmatpush1.bf16.msra.mxu1 %v2698_v59  ;;  %v106_v56 = vld [vmem:[#allocation5 + $0xf8] sm:$0xff]  ;;  %v2702_v59 = vcombine.low %v114_v47, %v122_v48 }
  0x8e   :  { %1103 = vmatprep.subr.bf16.mxu0 %v2681_v60  ;;  %1144 = vmatprep.subr.bf16.mxu1 %v2683_v63  ;;  %v2685_v60 = vcombine.high %v97_v50, %v105_v53  ;;  %v2687_v62 = vcombine.high %v98_v55, %v106_v56  ;;  %v82_v63 = vld [vmem:[#allocation5 + $0x38] sm:$0xff]  ;;  %v2686_v3 = vcombine.low %v98_v55, %v106_v56 }
  0x91   :  { %1104 = vmatpush1.bf16.msra.mxu0 %v2680_v1  ;;  %1145 = vmatpush1.bf16.msra.mxu1 %v2682_v4  ;;  %v90_v1 = vld [vmem:[#allocation5 + $0x78] sm:$0xff]  ;;  %v2669_v4 = vcombine.high %v81_v58, %v89_v61 }
  0x92   :  { %1105 = vmatprep.subr.bf16.mxu0 %v2665_v5  ;;  %1146 = vmatprep.subr.bf16.mxu1 %v2667_v8  ;;  %v2671_v5 = vcombine.high %v82_v63, %v90_v1  ;;  %v2670_v8 = vcombine.low %v82_v63, %v90_v1 }
  0x95   :  { %1106 = vmatpush1.bf16.msra.mxu0 %v2664_v9  ;;  %1147 = vmatpush1.bf16.msra.mxu1 %v2666_v13  ;;  %v3099_v9 = vld [vmem:[#allocation8 + $0xf8] sm:$0xff]   ;;  %v3102_v13 = vld [vmem:[#allocation8 + $0x70] sm:$0xff]  }
  0x96   :  { %1173 = vmatprep.subr.bf16.mxu0 %v2781_v14  ;;  %1214 = vmatprep.subr.bf16.mxu1 %v2783_v17  ;;  %v3103_v14 = vld [vmem:[#allocation8 + $0xf0] sm:$0xff]   ;;  %v3106_v17 = vld [vmem:[#allocation8 + $0x68] sm:$0xff]  }
  0x98   :  { %1124 = vmatmul.mubr.bf16.vlgmr.msra.gmra.mxu0 %v3390_v11  ;;  %1165 = vmatmul.mubr.bf16.vlgmr.msra.gmra.mxu1 %v3390_v11 }
  0x99   :  { %1174 = vmatpush1.bf16.msra.mxu0 %v2780_v18  ;;  %1215 = vmatpush1.bf16.msra.mxu1 %v2782_v21  ;;  %v3107_v18 = vld [vmem:[#allocation8 + $0xe8] sm:$0xff]   ;;  %v3110_v21 = vld [vmem:[#allocation8 + $0x60] sm:$0xff]  }
  0x9a   :  { %1175 = vmatprep.subr.bf16.mxu0 %v2765_v22  ;;  %1216 = vmatprep.subr.bf16.mxu1 %v2767_v24  ;;  %v3111_v22 = vld [vmem:[#allocation8 + $0xe0] sm:$0xff]  }
  0x9b   :  { %1205 = vmatprep.mubr.bf16.mxu0 %v3341_v0  ;;  %1246 = vmatprep.mubr.bf16.mxu1 %v3341_v0  ;;  %v121_v0 = vld [vmem:[#allocation5 + $0x170] sm:$0xff] }
  0x9c   :  { %v2701_v52 = vcombine.high %v113_v45, %v121_v0  ;;  %v2700_v57 = vcombine.low %v113_v45, %v121_v0  ;;  %v3113_v24 = vld [vmem:[#allocation8 + $0xa0] sm:$0xff]   ;;  %v3409_v45 = vld [vmem:[#allocation7] sm:$0xff] }
  0x9d   :  { %1176 = vmatpush1.bf16.msra.mxu0 %v2764_v26  ;;  %1217 = vmatpush1.bf16.msra.mxu1 %v2766_v29  ;;  %v3116_v26 = vld [vmem:[#allocation8 + $0x18] sm:$0xff]   ;;  %v3119_v29 = vld [vmem:[#allocation8 + $0xd0] sm:$0xff]  }
  0x9e   :  { %1177 = vmatprep.subr.bf16.mxu0 %v2749_v30  ;;  %1218 = vmatprep.subr.bf16.mxu1 %v2751_v33  ;;  %v3120_v30 = vld [vmem:[#allocation8 + $0x10] sm:$0xff]   ;;  %v3123_v33 = vld [vmem:[#allocation8 + $0xc8] sm:$0xff]  }
  0xa1   :  { %1178 = vmatpush1.bf16.msra.mxu0 %v2748_v34  ;;  %1219 = vmatpush1.bf16.msra.mxu1 %v2750_v37  ;;  %v3124_v34 = vld [vmem:[#allocation8 + $0x8] sm:$0xff]   ;;  %v3127_v37 = vld [vmem:[#allocation8 + $0xc0] sm:$0xff]  }
  0xa2   :  { %1179 = vmatprep.subr.bf16.mxu0 %v2733_v38  ;;  %1220 = vmatprep.subr.bf16.mxu1 %v2735_v41  ;;  %v3128_v38 = vld [vmem:[#allocation8] sm:$0xff]   ;;  %v3131_v41 = vld [vmem:[#allocation8 + $0x1f8] sm:$0xff]  }
  0xa5   :  { %1180 = vmatpush1.bf16.msra.mxu0 %v2732_v42  ;;  %1221 = vmatpush1.bf16.msra.mxu1 %v2734_v43  ;;  %v207_v42 = vlaneseq }
  0xa6   :  { %1181 = vmatprep.subr.bf16.mxu0 %v2717_v44  ;;  %1222 = vmatprep.subr.bf16.mxu1 %v2719_v46 }
  0xa7   :  { %v3406_v43 = vshrl.u32 %v207_v42, 7 }
  0xa9   :  { %1182 = vmatpush1.bf16.msra.mxu0 %v2716_v49  ;;  %1223 = vmatpush1.bf16.msra.mxu1 %v2718_v51  ;;  %v209_v44 = vsub.s32 0, %v3406_v43  ;;  %v217_v0 = vsub.s32 2, %v3406_v43  ;;  %v213_v46 = vsub.s32 1, %v3406_v43  ;;  %v221_v47 = vsub.s32 3, %v3406_v43 }
  0xaa   :  { %1183 = vmatprep.subr.bf16.mxu0 %v2701_v52  ;;  %1224 = vmatprep.subr.bf16.mxu1 %v2703_v54 }
  0xab   :  { %v210_v48 = vrot.slane %v3409_v45, %v209_v44  ;;  %v218_v49 = vrot.slane %v3409_v45, %v217_v0  ;;  %v214_v50 = vrot.slane %v3409_v45, %v213_v46  ;;  %v222_v52 = vrot.slane %v3409_v45, %v221_v47 }
  0xad   :  { %1184 = vmatpush1.bf16.msra.mxu0 %v2700_v57  ;;  %1225 = vmatpush1.bf16.msra.mxu1 %v2702_v59 }
  0xae   :  { %1185 = vmatprep.subr.bf16.mxu0 %v2685_v60  ;;  %1226 = vmatprep.subr.bf16.mxu1 %v2687_v62 }
  0xb1   :  { %1186 = vmatpush1.bf16.msra.mxu0 %v2684_v2  ;;  %1227 = vmatpush1.bf16.msra.mxu1 %v2686_v3 }
  0xb2   :  { %1187 = vmatprep.subr.bf16.mxu0 %v2669_v4  ;;  %1228 = vmatprep.subr.bf16.mxu1 %v2671_v5 }
  0xb5   :  { %1188 = vmatpush1.bf16.msra.mxu0 %v2668_v6  ;;  %1229 = vmatpush1.bf16.msra.mxu1 %v2670_v8 }
  0xb6   :  { %2913 = vmatprep.subr.bf16.mxu0 %v3098_v7  ;;  %2935 = vmatprep.subr.bf16.mxu1 %v3099_v9  ;;  %v3132_v7 = vld [vmem:[#allocation8 + $0x138] sm:$0xff]  }
  0xb8   :  { %1206 = vmatmul.mubr.bf16.vlgmr.msra.gmra.mxu0 %v3390_v11  ;;  %1247 = vmatmul.mubr.bf16.vlgmr.msra.gmra.mxu1 %v3390_v11  ;;  %v3114_v11 = vld [vmem:[#allocation8 + $0x58] sm:$0xff]  }
  0xb9   :  { %2914 = vmatpush3.bf16.msra.mxu0 %v3100_v10  ;;  %2936 = vmatpush3.bf16.msra.mxu1 %v3101_v12  ;;  %v3133_v10 = vld [vmem:[#allocation8 + $0x1b8] sm:$0xff]   ;;  %v3134_v12 = vld [vmem:[#allocation8 + $0x170] sm:$0xff]  }
  0xba   :  { %2915 = vmatprep.subr.bf16.mxu0 %v3102_v13  ;;  %2937 = vmatprep.subr.bf16.mxu1 %v3103_v14  ;;  %v3135_v13 = vld [vmem:[#allocation8 + $0x1f0] sm:$0xff]  }
  0xbb   :  { %v3136_v14 = vld [vmem:[#allocation8 + $0x130] sm:$0xff]  }
  0xbd   :  { %2916 = vmatpush3.bf16.msra.mxu0 %v3104_v15  ;;  %2938 = vmatpush3.bf16.msra.mxu1 %v3105_v16  ;;  %v3137_v15 = vld [vmem:[#allocation8 + $0x1b0] sm:$0xff]   ;;  %v3138_v16 = vld [vmem:[#allocation8 + $0x168] sm:$0xff]  }
  0xbe   :  { %2917 = vmatprep.subr.bf16.mxu0 %v3106_v17  ;;  %2939 = vmatprep.subr.bf16.mxu1 %v3107_v18  ;;  %v3139_v17 = vld [vmem:[#allocation8 + $0x1e8] sm:$0xff]  }
  0xbf   :  { %v3140_v18 = vld [vmem:[#allocation8 + $0x128] sm:$0xff]  }
  0xc1   :  { %2918 = vmatpush3.bf16.msra.mxu0 %v3108_v19  ;;  %2940 = vmatpush3.bf16.msra.mxu1 %v3109_v20  ;;  %v3141_v19 = vld [vmem:[#allocation8 + $0x1a8] sm:$0xff]   ;;  %v3142_v20 = vld [vmem:[#allocation8 + $0x160] sm:$0xff]  }
  0xc2   :  { %2919 = vmatprep.subr.bf16.mxu0 %v3110_v21  ;;  %2941 = vmatprep.subr.bf16.mxu1 %v3111_v22  ;;  %v3143_v21 = vld [vmem:[#allocation8 + $0x1e0] sm:$0xff]  }
  0xc3   :  { %v3144_v22 = vld [vmem:[#allocation8 + $0x120] sm:$0xff]  }
  0xc5   :  { %2920 = vmatpush3.bf16.msra.mxu0 %v3112_v23  ;;  %2942 = vmatpush3.bf16.msra.mxu1 %v3113_v24  ;;  %v3145_v23 = vld [vmem:[#allocation8 + $0x1a0] sm:$0xff]   ;;  %v3146_v24 = vld [vmem:[#allocation8 + $0x158] sm:$0xff]  }
  0xc6   :  { %2921 = vmatprep.subr.bf16.mxu0 %v3114_v11  ;;  %2943 = vmatprep.subr.bf16.mxu1 %v3115_v25  ;;  %v3147_v11 = vld [vmem:[#allocation8 + $0x1d8] sm:$0xff]  }
  0xc7   :  { %v3148_v25 = vld [vmem:[#allocation8 + $0x118] sm:$0xff]  }
  0xc9   :  { %2922 = vmatpush3.bf16.msra.mxu0 %v3116_v26  ;;  %2944 = vmatpush3.bf16.msra.mxu1 %v3117_v27  ;;  %v3149_v26 = vld [vmem:[#allocation8 + $0x198] sm:$0xff]   ;;  %v3150_v27 = vld [vmem:[#allocation8 + $0x150] sm:$0xff]  }
  0xca   :  { %2923 = vmatprep.subr.bf16.mxu0 %v3118_v28  ;;  %2945 = vmatprep.subr.bf16.mxu1 %v3119_v29  ;;  %v3151_v28 = vld [vmem:[#allocation8 + $0x1d0] sm:$0xff]   ;;  %v225_v29 = vsub.s32 4, %v3406_v43 }
  0xcd   :  { %2924 = vmatpush3.bf16.msra.mxu0 %v3120_v30  ;;  %2946 = vmatpush3.bf16.msra.mxu1 %v3121_v31  ;;  %v233_v30 = vsub.s32 6, %v3406_v43  ;;  %v3152_v31 = vld [vmem:[#allocation8 + $0x110] sm:$0xff]  }
  0xce   :  { %2925 = vmatprep.subr.bf16.mxu0 %v3122_v32  ;;  %2947 = vmatprep.subr.bf16.mxu1 %v3123_v33  ;;  %v229_v32 = vsub.s32 5, %v3406_v43  ;;  %v3153_v33 = vld [vmem:[#allocation8 + $0x190] sm:$0xff]  }
  0xd1   :  { %2926 = vmatpush3.bf16.msra.mxu0 %v3124_v34  ;;  %2948 = vmatpush3.bf16.msra.mxu1 %v3125_v35  ;;  %v237_v34 = vsub.s32 7, %v3406_v43  ;;  %v3154_v35 = vld [vmem:[#allocation8 + $0x148] sm:$0xff]  }
  0xd2   :  { %2927 = vmatprep.subr.bf16.mxu0 %v3126_v36  ;;  %2949 = vmatprep.subr.bf16.mxu1 %v3127_v37  ;;  %v226_v36 = vrot.slane %v3409_v45, %v225_v29  ;;  %v3155_v37 = vld [vmem:[#allocation8 + $0x1c8] sm:$0xff]  }
  0xd3   :  { %v238_v42 = vrot.slane %v3409_v45, %v237_v34 }
  0xd5   :  { %2928 = vmatpush3.bf16.msra.mxu0 %v3128_v38  ;;  %2950 = vmatpush3.bf16.msra.mxu1 %v3129_v39  ;;  %v234_v38 = vrot.slane %v3409_v45, %v233_v30  ;;  %v230_v39 = vrot.slane %v3409_v45, %v229_v32  ;;  %v3161_v45 = vld [vmem:[#allocation8 + $0x180] sm:$0xff]  }
  0xd6   :  { %2957 = vmatprep.subr.bf16.mxu0 %v3130_v40  ;;  %2979 = vmatprep.subr.bf16.mxu1 %v3131_v41  ;;  %v3156_v40 = vld [vmem:[#allocation8 + $0x108] sm:$0xff]  }
 0x118   :  { %v961_v51 = vpop.f32.mrf.mxu0  ;;  %v1002_v54 = vpop.f32.mrf.mxu1 }
 0x119   :  { %v962_v53 = vadd.f32 %v961_v51, %v210_v48  ;;  %v1003_v55 = vadd.f32 %v1002_v54, %v218_v49  ;;  %v3157_v48 = vld [vmem:[#allocation8 + $0x188] sm:$0xff]   ;;  %v3158_v49 = vld [vmem:[#allocation8 + $0x140] sm:$0xff]  }
 0x11a   :  { %v963_v56 = vpop.f32.mrf.mxu0  ;;  %v1004_v58 = vpop.f32.mrf.mxu1 }
 0x11b   :  { %v964_v57 = vadd.f32 %v963_v56, %v214_v50  ;;  %v1255_v59 = vmax.f32 %v962_v53, 0.0  ;;  %v1257_v60 = vmax.f32 %v1003_v55, 0.0  ;;  %v1005_v61 = vadd.f32 %v1004_v58, %v222_v52  ;;  %v3159_v52 = vld [vmem:[#allocation8 + $0x1c0] sm:$0xff]  }
 0x11c   :  { %v965_v62 = vpop.f32.mrf.mxu0  ;;  %v1006_v1 = vpop.f32.mrf.mxu1 }
 0x11d   :  { %v1256_v63 = vmax.f32 %v964_v57, 0.0  ;;  %v1258_v2 = vmax.f32 %v1005_v61, 0.0  ;;  %v1273_v4 = vpack.c.bf16 %v1257_v60, %v1257_v60  ;;  %v1271_v8 = vpack.c.bf16 %v1255_v59, %v1255_v59  ;;  %v3160_v57 = vld [vmem:[#allocation8 + $0x100] sm:$0xff]   ;;  %v3162_v62 = vld [vmem:[#allocation8 + $0x278] sm:$0xff]  }
 0x11e   :  { %v966_v3 = vpop.f32.mrf.mxu0  ;;  %v1007_v6 = vpop.f32.mrf.mxu1 }
 0x11f   :  { %v1272_v5 = vpack.c.bf16 %v1256_v63, %v1256_v63  ;;  %v1274_v9 = vpack.c.bf16 %v1258_v2, %v1258_v2  ;;  %v3163_v2 = vld [vmem:[#allocation8 + $0x2f8] sm:$0xff]  }
 0x121   :  { %2350 = vmatprep.mubr.bf16.mxu0 %v1272_v5  ;;  %2390 = vmatprep.mubr.bf16.mxu1 %v1274_v9 }
 0x122   :  { %2351 = vmatmul.mubr.bf16.vlgmr.msra.gmra.mxu0 %v1271_v8  ;;  %2391 = vmatmul.mubr.bf16.vlgmr.msra.gmra.mxu1 %v1273_v4  ;;  %v3164_v8 = vld [vmem:[#allocation8 + $0x238] sm:$0xff]  }
 0x123   :  { %2958 = vmatpush3.bf16.msra.mxu0 %v3132_v7  ;;  %2980 = vmatpush3.bf16.msra.mxu1 %v3133_v10 }
 0x124   :  { %2959 = vmatprep.subr.bf16.mxu0 %v3134_v12  ;;  %2981 = vmatprep.subr.bf16.mxu1 %v3135_v13  ;;  %v3165_v12 = vld [vmem:[#allocation8 + $0x2b8] sm:$0xff]   ;;  %v3166_v13 = vld [vmem:[#allocation8 + $0x270] sm:$0xff]  }
 0x127   :  { %2960 = vmatpush3.bf16.msra.mxu0 %v3136_v14  ;;  %2982 = vmatpush3.bf16.msra.mxu1 %v3137_v15  ;;  %v3167_v14 = vld [vmem:[#allocation8 + $0x2f0] sm:$0xff]  }
 0x128   :  { %2961 = vmatprep.subr.bf16.mxu0 %v3138_v16  ;;  %2983 = vmatprep.subr.bf16.mxu1 %v3139_v17  ;;  %v3168_v15 = vld [vmem:[#allocation8 + $0x230] sm:$0xff]   ;;  %v3170_v17 = vld [vmem:[#allocation8 + $0x268] sm:$0xff]  }
 0x129   :  { %v3169_v16 = vld [vmem:[#allocation8 + $0x2b0] sm:$0xff]  }
 0x12b   :  { %2962 = vmatpush3.bf16.msra.mxu0 %v3140_v18  ;;  %2984 = vmatpush3.bf16.msra.mxu1 %v3141_v19  ;;  %v3171_v18 = vld [vmem:[#allocation8 + $0x2e8] sm:$0xff]  }
 0x12c   :  { %2963 = vmatprep.subr.bf16.mxu0 %v3142_v20  ;;  %2985 = vmatprep.subr.bf16.mxu1 %v3143_v21  ;;  %v3172_v19 = vld [vmem:[#allocation8 + $0x228] sm:$0xff]   ;;  %v3174_v21 = vld [vmem:[#allocation8 + $0x260] sm:$0xff]  }
 0x12d   :  { %v3173_v20 = vld [vmem:[#allocation8 + $0x2a8] sm:$0xff]  }
 0x12f   :  { %2964 = vmatpush3.bf16.msra.mxu0 %v3144_v22  ;;  %2986 = vmatpush3.bf16.msra.mxu1 %v3145_v23  ;;  %v3175_v22 = vld [vmem:[#allocation8 + $0x2e0] sm:$0xff]  }
 0x130   :  { %2965 = vmatprep.subr.bf16.mxu0 %v3146_v24  ;;  %2987 = vmatprep.subr.bf16.mxu1 %v3147_v11  ;;  %v3176_v23 = vld [vmem:[#allocation8 + $0x220] sm:$0xff]   ;;  %v3178_v11 = vld [vmem:[#allocation8 + $0x258] sm:$0xff]  }
 0x131   :  { %v3177_v24 = vld [vmem:[#allocation8 + $0x2a0] sm:$0xff]  }
 0x133   :  { %2966 = vmatpush3.bf16.msra.mxu0 %v3148_v25  ;;  %2988 = vmatpush3.bf16.msra.mxu1 %v3149_v26  ;;  %v3179_v25 = vld [vmem:[#allocation8 + $0x2d8] sm:$0xff]  }
 0x134   :  { %2967 = vmatprep.subr.bf16.mxu0 %v3150_v27  ;;  %2989 = vmatprep.subr.bf16.mxu1 %v3151_v28  ;;  %v3180_v26 = vld [vmem:[#allocation8 + $0x218] sm:$0xff]   ;;  %v3182_v28 = vld [vmem:[#allocation8 + $0x250] sm:$0xff]  }
 0x135   :  { %v3181_v27 = vld [vmem:[#allocation8 + $0x298] sm:$0xff]  }
 0x137   :  { %2968 = vmatpush3.bf16.msra.mxu0 %v3152_v31  ;;  %2990 = vmatpush3.bf16.msra.mxu1 %v3153_v33  ;;  %v3183_v31 = vld [vmem:[#allocation8 + $0x2d0] sm:$0xff]   ;;  %v3442_v33 = vld [vmem:[#allocation7 + $0x8] sm:$0xff] }
 0x138   :  { %v1043_v41 = vpop.f32.mrf.mxu0  ;;  %2969 = vmatprep.subr.bf16.mxu0 %v3154_v35  ;;  %v1084_v51 = vpop.f32.mrf.mxu1  ;;  %2991 = vmatprep.subr.bf16.mxu1 %v3155_v37  ;;  %v3184_v35 = vld [vmem:[#allocation8 + $0x210] sm:$0xff]   ;;  %v3186_v37 = vld [vmem:[#allocation8 + $0x248] sm:$0xff]  }
 0x139   :  { %v1044_v50 = vadd.f32 %v1043_v41, %v226_v36  ;;  %v1085_v53 = vadd.f32 %v1084_v51, %v234_v38  ;;  %v3185_v36 = vld [vmem:[#allocation8 + $0x290] sm:$0xff]   ;;  %v242_v38 = vrot.slane %v3442_v33, %v209_v44  ;;  %v246_v41 = vrot.slane %v3442_v33, %v213_v46  ;;  %v3190_v44 = vld [vmem:[#allocation8 + $0x240] sm:$0xff]  }
 0x13a   :  { %v1045_v54 = vpop.f32.mrf.mxu0  ;;  %v1086_v56 = vpop.f32.mrf.mxu1  ;;  %v3192_v46 = vld [vmem:[#allocation8 + $0x200] sm:$0xff]  }
 0x13b   :  { %v1046_v55 = vadd.f32 %v1045_v54, %v230_v39  ;;  %2970 = vmatpush3.bf16.msra.mxu0 %v3156_v40  ;;  %v1259_v58 = vmax.f32 %v1044_v50, 0.0  ;;  %v1261_v59 = vmax.f32 %v1085_v53, 0.0  ;;  %v1087_v60 = vadd.f32 %v1086_v56, %v238_v42  ;;  %2992 = vmatpush3.bf16.msra.mxu1 %v3157_v48  ;;  %v3187_v39 = vld [vmem:[#allocation8 + $0x2c8] sm:$0xff]   ;;  %v3191_v53 = vld [vmem:[#allocation8 + $0x2c0] sm:$0xff]  }
 0x13c   :  { %v1047_v61 = vpop.f32.mrf.mxu0  ;;  %2971 = vmatprep.subr.bf16.mxu0 %v3158_v49  ;;  %v1088_v1 = vpop.f32.mrf.mxu1  ;;  %2993 = vmatprep.subr.bf16.mxu1 %v3159_v52  ;;  %v250_v40 = vrot.slane %v3442_v33, %v217_v0  ;;  %v3188_v42 = vld [vmem:[#allocation8 + $0x208] sm:$0xff]   ;;  %v254_v49 = vrot.slane %v3442_v33, %v221_v47  ;;  %v3193_v47 = vld [vmem:[#allocation8 + $0x280] sm:$0xff]  }
 0x13d   :  { %v1260_v63 = vmax.f32 %v1046_v55, 0.0  ;;  %v1262_v3 = vmax.f32 %v1087_v60, 0.0  ;;  %v1277_v5 = vpack.c.bf16 %v1261_v59, %v1261_v59  ;;  %v1275_v9 = vpack.c.bf16 %v1259_v58, %v1259_v58  ;;  %v3189_v50 = vld [vmem:[#allocation8 + $0x288] sm:$0xff]   ;;  %v3194_v61 = vld [vmem:[#allocation8 + $0x378] sm:$0xff]  }
 0x13e   :  { %v1048_v4 = vpop.f32.mrf.mxu0  ;;  %v1089_v7 = vpop.f32.mrf.mxu1 }
 0x13f   :  { %v1276_v6 = vpack.c.bf16 %v1260_v63, %v1260_v63  ;;  %2972 = vmatpush3.bf16.msra.mxu0 %v3160_v57  ;;  %v1278_v10 = vpack.c.bf16 %v1262_v3, %v1262_v3  ;;  %2994 = vmatpush3.bf16.msra.mxu1 %v3161_v45  ;;  %v3195_v63 = vld [vmem:[#allocation8 + $0x3f8] sm:$0xff]  }
 0x140   :  { %3001 = vmatprep.subr.bf16.mxu0 %v3162_v62  ;;  %3023 = vmatprep.subr.bf16.mxu1 %v3163_v2 }
 0x141   :  { %2430 = vmatprep.mubr.bf16.mxu0 %v1276_v6  ;;  %2470 = vmatprep.mubr.bf16.mxu1 %v1278_v10  ;;  %v3196_v6 = vld [vmem:[#allocation8 + $0x338] sm:$0xff]   ;;  %v3198_v10 = vld [vmem:[#allocation8 + $0x370] sm:$0xff]  }
 0x142   :  { %2431 = vmatmul.mubr.bf16.vlgmr.msra.gmra.mxu0 %v1275_v9  ;;  %2471 = vmatmul.mubr.bf16.vlgmr.msra.gmra.mxu1 %v1277_v5  ;;  %v3197_v9 = vld [vmem:[#allocation8 + $0x3b8] sm:$0xff]  }
 0x143   :  { %3002 = vmatpush3.bf16.msra.mxu0 %v3164_v8  ;;  %3024 = vmatpush3.bf16.msra.mxu1 %v3165_v12  ;;  %v3199_v12 = vld [vmem:[#allocation8 + $0x3f0] sm:$0xff]  }
 0x144   :  { %3003 = vmatprep.subr.bf16.mxu0 %v3166_v13  ;;  %3025 = vmatprep.subr.bf16.mxu1 %v3167_v14  ;;  %v3200_v13 = vld [vmem:[#allocation8 + $0x330] sm:$0xff]  }
 0x145   :  { %v3201_v14 = vld [vmem:[#allocation8 + $0x3b0] sm:$0xff]  }
 0x147   :  { %3004 = vmatpush3.bf16.msra.mxu0 %v3168_v15  ;;  %3026 = vmatpush3.bf16.msra.mxu1 %v3169_v16  ;;  %v3202_v15 = vld [vmem:[#allocation8 + $0x368] sm:$0xff]  }
 0x148   :  { %3005 = vmatprep.subr.bf16.mxu0 %v3170_v17  ;;  %3027 = vmatprep.subr.bf16.mxu1 %v3171_v18  ;;  %v3203_v16 = vld [vmem:[#allocation8 + $0x3e8] sm:$0xff]  }
 0x149   :  { %v3204_v17 = vld [vmem:[#allocation8 + $0x328] sm:$0xff]  }
 0x14a   :  { %v3205_v18 = vld [vmem:[#allocation8 + $0x3a8] sm:$0xff]  }
 0x14b   :  { %3006 = vmatpush3.bf16.msra.mxu0 %v3172_v19  ;;  %3028 = vmatpush3.bf16.msra.mxu1 %v3173_v20  ;;  %v3206_v19 = vld [vmem:[#allocation8 + $0x360] sm:$0xff]  }
 0x14c   :  { %3007 = vmatprep.subr.bf16.mxu0 %v3174_v21  ;;  %3029 = vmatprep.subr.bf16.mxu1 %v3175_v22  ;;  %v3207_v20 = vld [vmem:[#allocation8 + $0x3e0] sm:$0xff]  }
 0x14d   :  { %v3208_v21 = vld [vmem:[#allocation8 + $0x320] sm:$0xff]  }
 0x14e   :  { %v3209_v22 = vld [vmem:[#allocation8 + $0x3a0] sm:$0xff]  }
 0x14f   :  { %3008 = vmatpush3.bf16.msra.mxu0 %v3176_v23  ;;  %3030 = vmatpush3.bf16.msra.mxu1 %v3177_v24  ;;  %v3210_v23 = vld [vmem:[#allocation8 + $0x358] sm:$0xff]  }
 0x150   :  { %3009 = vmatprep.subr.bf16.mxu0 %v3178_v11  ;;  %3031 = vmatprep.subr.bf16.mxu1 %v3179_v25  ;;  %v3211_v24 = vld [vmem:[#allocation8 + $0x3d8] sm:$0xff]  }
 0x151   :  { %v3212_v11 = vld [vmem:[#allocation8 + $0x318] sm:$0xff]  }
 0x152   :  { %v3213_v25 = vld [vmem:[#allocation8 + $0x398] sm:$0xff]  }
 0x153   :  { %3010 = vmatpush3.bf16.msra.mxu0 %v3180_v26  ;;  %3032 = vmatpush3.bf16.msra.mxu1 %v3181_v27  ;;  %v3214_v26 = vld [vmem:[#allocation8 + $0x350] sm:$0xff]  }
 0x154   :  { %3011 = vmatprep.subr.bf16.mxu0 %v3182_v28  ;;  %3033 = vmatprep.subr.bf16.mxu1 %v3183_v31  ;;  %v3215_v27 = vld [vmem:[#allocation8 + $0x3d0] sm:$0xff]  }
 0x155   :  { %v3216_v28 = vld [vmem:[#allocation8 + $0x310] sm:$0xff]  }
 0x156   :  { %v3217_v31 = vld [vmem:[#allocation8 + $0x390] sm:$0xff]  }
 0x157   :  { %3012 = vmatpush3.bf16.msra.mxu0 %v3184_v35  ;;  %3034 = vmatpush3.bf16.msra.mxu1 %v3185_v36  ;;  %v3218_v35 = vld [vmem:[#allocation8 + $0x348] sm:$0xff]   ;;  %v258_v36 = vrot.slane %v3442_v33, %v225_v29  ;;  %v3222_v29 = vld [vmem:[#allocation8 + $0x340] sm:$0xff]  }
 0x158   :  { %v1125_v48 = vpop.f32.mrf.mxu0  ;;  %3013 = vmatprep.subr.bf16.mxu0 %v3186_v37  ;;  %v1166_v52 = vpop.f32.mrf.mxu1  ;;  %3035 = vmatprep.subr.bf16.mxu1 %v3187_v39  ;;  %v3219_v37 = vld [vmem:[#allocation8 + $0x3c8] sm:$0xff]   ;;  %v262_v39 = vrot.slane %v3442_v33, %v229_v32  ;;  %v3224_v32 = vld [vmem:[#allocation8 + $0x300] sm:$0xff]  }
 0x159   :  { %v1126_v51 = vadd.f32 %v1125_v48, %v242_v38  ;;  %v1167_v0 = vadd.f32 %v1166_v52, %v250_v40  ;;  %v266_v38 = vrot.slane %v3442_v33, %v233_v30  ;;  %v3220_v40 = vld [vmem:[#allocation8 + $0x308] sm:$0xff]  }
 0x15a   :  { %v1127_v54 = vpop.f32.mrf.mxu0  ;;  %v1168_v56 = vpop.f32.mrf.mxu1  ;;  %v3221_v48 = vld [vmem:[#allocation8 + $0x388] sm:$0xff]  }
 0x15b   :  { %v1128_v55 = vadd.f32 %v1127_v54, %v246_v41  ;;  %3014 = vmatpush3.bf16.msra.mxu0 %v3188_v42  ;;  %v1263_v57 = vmax.f32 %v1126_v51, 0.0  ;;  %v1265_v58 = vmax.f32 %v1167_v0, 0.0  ;;  %v1169_v59 = vadd.f32 %v1168_v56, %v254_v49  ;;  %3036 = vmatpush3.bf16.msra.mxu1 %v3189_v50 }
 0x15c   :  { %v1129_v60 = vpop.f32.mrf.mxu0  ;;  %3015 = vmatprep.subr.bf16.mxu0 %v3190_v44  ;;  %v1170_v62 = vpop.f32.mrf.mxu1  ;;  %3037 = vmatprep.subr.bf16.mxu1 %v3191_v53  ;;  %v270_v42 = vrot.slane %v3442_v33, %v237_v34  ;;  %v3223_v44 = vld [vmem:[#allocation8 + $0x3c0] sm:$0xff]  }
 0x15d   :  { %v1264_v45 = vmax.f32 %v1128_v55, 0.0  ;;  %v1266_v1 = vmax.f32 %v1169_v59, 0.0  ;;  %v1281_v3 = vpack.c.bf16 %v1265_v58, %v1265_v58  ;;  %v1279_v7 = vpack.c.bf16 %v1263_v57, %v1263_v57  ;;  %v3225_v34 = vld [vmem:[#allocation8 + $0x380] sm:$0xff]  }
 0x15e   :  { %v1130_v2 = vpop.f32.mrf.mxu0  ;;  %v1171_v5 = vpop.f32.mrf.mxu1 }
 0x15f   :  { %v1280_v4 = vpack.c.bf16 %v1264_v45, %v1264_v45  ;;  %3016 = vmatpush3.bf16.msra.mxu0 %v3192_v46  ;;  %v1282_v8 = vpack.c.bf16 %v1266_v1, %v1266_v1  ;;  %3038 = vmatpush3.bf16.msra.mxu1 %v3193_v47 }
 0x160   :  { %3045 = vmatprep.subr.bf16.mxu0 %v3194_v61  ;;  %3067 = vmatprep.subr.bf16.mxu1 %v3195_v63  ;;  %v2784_v63 = vld [vmem:[%s3478_s4] ss:$0 sm:$0xff]  ;;  %s3342_s4 = smov [#allocation10]  }
 0x161   :  { %2510 = vmatprep.mubr.bf16.mxu0 %v1280_v4  ;;  %2550 = vmatprep.mubr.bf16.mxu1 %v1282_v8  ;;  %s2645_s14 = sshll.u32 %s3342_s4, 4  ;;  %s2646_s14 = int_to_ptr.vmem [resolvable:$true] %s2645_s14 }
 0x162   :  { %2511 = vmatmul.mubr.bf16.vlgmr.msra.gmra.mxu0 %v1279_v7  ;;  %2551 = vmatmul.mubr.bf16.vlgmr.msra.gmra.mxu1 %v1281_v3  ;;  %s3306_s15 = scalar_lea.vmem %s2646_s14, 128  ;;  %p3311_p7 = scmp.lt.s32.totalorder %s2646_s14, %s2646_s14 }
 0x163   :  { %3046 = vmatpush3.bf16.msra.mxu0 %v3196_v6  ;;  %3068 = vmatpush3.bf16.msra.mxu1 %v3197_v9  ;;  %p3307_p6 = scmp.ne.s32.totalorder %s2646_s14, %s3306_s15  ;;  %p3312_p8 = scmp.lt.s32.totalorder %s3306_s15, %s3306_s15 }
 0x164   :  { %3047 = vmatprep.subr.bf16.mxu0 %v3198_v10  ;;  %3069 = vmatprep.subr.bf16.mxu1 %v3199_v12 }
 0x165   :  { %p3313_p9 = por %p3312_p8, %p3311_p7 }
 0x167   :  { %3048 = vmatpush3.bf16.msra.mxu0 %v3200_v13  ;;  %3070 = vmatpush3.bf16.msra.mxu1 %v3201_v14  ;;  %p3314_p10 = pnand %p3313_p9, %p3307_p6 }
 0x168   :  { %3049 = vmatprep.subr.bf16.mxu0 %v3202_v15  ;;  %3071 = vmatprep.subr.bf16.mxu1 %v3203_v16 }
 0x16b   :  { %3050 = vmatpush3.bf16.msra.mxu0 %v3204_v17  ;;  %3072 = vmatpush3.bf16.msra.mxu1 %v3205_v18 }
 0x16c   :  { %3051 = vmatprep.subr.bf16.mxu0 %v3206_v19  ;;  %3073 = vmatprep.subr.bf16.mxu1 %v3207_v20 }
 0x16f   :  { %3052 = vmatpush3.bf16.msra.mxu0 %v3208_v21  ;;  %3074 = vmatpush3.bf16.msra.mxu1 %v3209_v22 }
 0x170   :  { %3053 = vmatprep.subr.bf16.mxu0 %v3210_v23  ;;  %3075 = vmatprep.subr.bf16.mxu1 %v3211_v24 }
 0x173   :  { %3054 = vmatpush3.bf16.msra.mxu0 %v3212_v11  ;;  %3076 = vmatpush3.bf16.msra.mxu1 %v3213_v25 }
 0x174   :  { %3055 = vmatprep.subr.bf16.mxu0 %v3214_v26  ;;  %3077 = vmatprep.subr.bf16.mxu1 %v3215_v27 }
 0x177   :  { %3056 = vmatpush3.bf16.msra.mxu0 %v3216_v28  ;;  %3078 = vmatpush3.bf16.msra.mxu1 %v3217_v31 }
 0x178   :  { %v1207_v41 = vpop.f32.mrf.mxu0  ;;  %3057 = vmatprep.subr.bf16.mxu0 %v3218_v35  ;;  %v1248_v50 = vpop.f32.mrf.mxu1  ;;  %3079 = vmatprep.subr.bf16.mxu1 %v3219_v37 }
 0x179   :  { %v1208_v49 = vadd.f32 %v1207_v41, %v258_v36  ;;  %v1249_v30 = vadd.f32 %v1248_v50, %v266_v38 }
 0x17a   :  { %v1209_v51 = vpop.f32.mrf.mxu0  ;;  %v1250_v53 = vpop.f32.mrf.mxu1 }
 0x17b   :  { %v1210_v52 = vadd.f32 %v1209_v51, %v262_v39  ;;  %3058 = vmatpush3.bf16.msra.mxu0 %v3220_v40  ;;  %v1267_v0 = vmax.f32 %v1208_v49, 0.0  ;;  %v1269_v54 = vmax.f32 %v1249_v30, 0.0  ;;  %v1251_v55 = vadd.f32 %v1250_v53, %v270_v42  ;;  %3080 = vmatpush3.bf16.msra.mxu1 %v3221_v48 }
 0x17c   :  { %v1211_v43 = vpop.f32.mrf.mxu0  ;;  %3059 = vmatprep.subr.bf16.mxu0 %v3222_v29  ;;  %v1252_v56 = vpop.f32.mrf.mxu1  ;;  %3081 = vmatprep.subr.bf16.mxu1 %v3223_v44 }
 0x17d   :  { %v1268_v33 = vmax.f32 %v1210_v52, 0.0  ;;  %v1270_v46 = vmax.f32 %v1251_v55, 0.0  ;;  %v1285_v58 = vpack.c.bf16 %v1269_v54, %v1269_v54  ;;  %v1283_v47 = vpack.c.bf16 %v1267_v0, %v1267_v0 }
 0x17e   :  { %v1212_v57 = vpop.f32.mrf.mxu0  ;;  %v1253_v60 = vpop.f32.mrf.mxu1 }
 0x17f   :  { %v1284_v59 = vpack.c.bf16 %v1268_v33, %v1268_v33  ;;  %3060 = vmatpush3.bf16.msra.mxu0 %v3224_v32  ;;  %v1286_v61 = vpack.c.bf16 %v1270_v46, %v1270_v46  ;;  %3082 = vmatpush3.bf16.msra.mxu1 %v3225_v34 }
 0x181   :  { %2590 = vmatprep.mubr.bf16.mxu0 %v1284_v59  ;;  %2630 = vmatprep.mubr.bf16.mxu1 %v1286_v61 }
 0x182   :  { %2591 = vmatmul.mubr.bf16.vlgmr.msra.gmra.mxu0 %v1283_v47  ;;  %2631 = vmatmul.mubr.bf16.vlgmr.msra.gmra.mxu1 %v1285_v58 }
 0x1e2   :  { %v2929_v45 = vpop.f32.mrf.mxu0  ;;  %v2951_v62 = vpop.f32.mrf.mxu1 }
 0x1e4   :  { %v2930_v1 = vpop.f32.mrf.mxu0  ;;  %v2952_v3 = vpop.f32.mrf.mxu1 }
 0x1e5   :  { %v2931_v2 = vadd.f32 %v2930_v1, %v2929_v45  ;;  %v2953_v4 = vadd.f32 %v2952_v3, %v2951_v62 }
 0x1e6   :  { %v2932_v5 = vpop.f32.mrf.mxu0  ;;  %v2954_v7 = vpop.f32.mrf.mxu1 }
 0x1e7   :  { %v2353_v6 = vadd.f32 %v2931_v2, %v2784_v63 }
 0x1e8   :  { %v2933_v8 = vpop.f32.mrf.mxu0  ;;  %v2955_v10 = vpop.f32.mrf.mxu1 }
 0x1e9   :  { %v2393_v9 = vadd.f32 %v2953_v4, %v2353_v6 }
 0x202   :  { %v2973_v12 = vpop.f32.mrf.mxu0  ;;  %v2995_v13 = vpop.f32.mrf.mxu1 }
 0x204   :  { %v2974_v14 = vpop.f32.mrf.mxu0  ;;  %v2996_v15 = vpop.f32.mrf.mxu1 }
 0x205   :  { %v2975_v27 = vadd.f32 %v2974_v14, %v2973_v12  ;;  %v2997_v31 = vadd.f32 %v2996_v15, %v2995_v13 }
 0x206   :  { %v2976_v16 = vpop.f32.mrf.mxu0  ;;  %v2998_v17 = vpop.f32.mrf.mxu1 }
 0x207   :  { %v2433_v28 = vadd.f32 %v2975_v27, %v2393_v9 }
 0x208   :  { %v2977_v18 = vpop.f32.mrf.mxu0  ;;  %v2999_v19 = vpop.f32.mrf.mxu1 }
 0x209   :  { %v2473_v36 = vadd.f32 %v2997_v31, %v2433_v28 }
 0x222   :  { %v3017_v20 = vpop.f32.mrf.mxu0  ;;  %v3039_v21 = vpop.f32.mrf.mxu1 }
 0x224   :  { %v3018_v22 = vpop.f32.mrf.mxu0  ;;  %v3040_v23 = vpop.f32.mrf.mxu1 }
 0x225   :  { %v3019_v35 = vadd.f32 %v3018_v22, %v3017_v20  ;;  %v3041_v39 = vadd.f32 %v3040_v23, %v3039_v21 }
 0x226   :  { %v3020_v24 = vpop.f32.mrf.mxu0  ;;  %v3042_v11 = vpop.f32.mrf.mxu1 }
 0x227   :  { %v2513_v37 = vadd.f32 %v3019_v35, %v2473_v36 }
 0x228   :  { %v3021_v25 = vpop.f32.mrf.mxu0  ;;  %v3043_v26 = vpop.f32.mrf.mxu1 }
 0x229   :  { %v2553_v42 = vadd.f32 %v3041_v39, %v2513_v37 }
 0x242   :  { %v3061_v38 = vpop.f32.mrf.mxu0  ;;  %v3083_v40 = vpop.f32.mrf.mxu1 }
 0x244   :  { %v3062_v41 = vpop.f32.mrf.mxu0  ;;  %v3084_v29 = vpop.f32.mrf.mxu1 }
 0x245   :  { %v3063_v48 = vadd.f32 %v3062_v41, %v3061_v38  ;;  %v3085_v44 = vadd.f32 %v3084_v29, %v3083_v40 }
 0x246   :  { %v3064_v49 = vpop.f32.mrf.mxu0  ;;  %v3086_v30 = vpop.f32.mrf.mxu1 }
 0x247   :  { %v2593_v50 = vadd.f32 %v3063_v48, %v2553_v42 }
 0x248   :  { %v3065_v51 = vpop.f32.mrf.mxu0  ;;  %v3087_v53 = vpop.f32.mrf.mxu1 }
 0x249   :  { %v2633_v52 = vadd.f32 %v3085_v44, %v2593_v50 }
 0x24b   :  { %2638 = vst [vmem:[#allocation10] sm:$0xff] %v2633_v52 }
 0x24c   :  { %3317 = shalt.err (!%p3314_p10)
}
 0x24d   :  { %2648 = dma.vmem_to_hbm [thread:$0]  %s2646_s14, 128, %s3479_s5, [#allocation4]  }
 0x24e   :  { %3332 = dma.done.wait [#allocation4], 128  }
 0x24f   :  { %3333 = vsyncadd [#allocation4], 4294967168 }
 0x250   :  { %2652 = vsyncpa [#allocation3], 1 }
 0x251   :  { %2653 = vsyncpa [#allocation6], 1 }
 0x252   :  { %2654 = vsyncpa [#allocation9], 1 }
 0x253   :  { %2655 = vsyncpa [#allocation4], 1 }

</bundles_post_ra>
